<compile_context>
chip_gen: v5e
topology: v5e:2x2
jax: 0.10.0
libtpu: 0.0.40
codegen_flags: <defaults>
</compile_context>

<pallas_src>
import functools

import numpy as np
import jax
import jax.numpy as jnp
from jax.experimental import pallas as pl
from jax.experimental.pallas import tpu as pltpu

BN_EPS = 1e-5


def conv2d_size_out(size, kernel_size, stride):
    return (size - (kernel_size - 1) - 1) // stride + 1


def _round_up(x, m):
    return (x + m - 1) // m * m


# ----------------------------------------------------------------------------
# In-kernel helpers
# ----------------------------------------------------------------------------
def _bn_relu(y, gamma_ref, beta_ref, m_valid):
    """Training-mode BatchNorm (batch statistics) + ReLU, folded to scale/shift.

    y: (m_pad, C) f32, rows = flattened (n, oh, ow) pixels; rows >= m_valid are
    zero (zero-padded patches x weights, no bias) and are masked out of the
    statistics.  Two-pass (centered) variance -> no cancellation, var >= 0.
    The per-row validity mask is O(m_pad) work (a single tiny iota), NOT the
    O(m_out * m_in) mask builds the old kernel did.
    """
    m_pad = y.shape[0]
    rows = jax.lax.broadcasted_iota(jnp.int32, (m_pad, 1), 0)
    mask = (rows < m_valid).astype(jnp.float32)
    inv_n = jnp.float32(1.0 / m_valid)
    mean = jnp.sum(y * mask, axis=0, keepdims=True) * inv_n
    centered = (y - mean) * mask
    var = jnp.sum(centered * centered, axis=0, keepdims=True) * inv_n
    scale = gamma_ref[...] * jax.lax.rsqrt(var + BN_EPS)
    shift = beta_ref[...] - mean * scale
    return jnp.maximum(y * scale + shift, jnp.float32(0.0))


def _dqn_fused_kernel(p1_ref, w1_ref, g1_ref, b1_ref,
                      sel2_ref, w2_ref, g2_ref, b2_ref,
                      sel3_ref, w3_ref, g3_ref, b3_ref,
                      wh_ref, bh_ref,
                      out_ref, *, m_valid, batch):
    # ---- conv1 + bn1 + relu: input already im2col'd in the wrapper ----------
    # p1: (m1_pad, 9*Cin), w1: (9*Cin, 16)  -> single K = 9*Cin matmul.
    y = jnp.dot(p1_ref[...], w1_ref[...], preferred_element_type=jnp.float32)
    a = _bn_relu(y, g1_ref, b1_ref, m_valid[0])

    # ---- conv2 / conv3 -------------------------------------------------------
    # Per tap b: a 0/1 sel matmul gathers the needed input rows (precomputed
    # matrices -> no in-kernel mask build); the 9 pieces are lane-concatenated
    # to (m_pad, 9*Cin) and fed to ONE conv matmul with the pre-stacked weight.
    for sel_ref, w_ref, g_ref, b_ref, mv in (
            (sel2_ref, w2_ref, g2_ref, b2_ref, m_valid[1]),
            (sel3_ref, w3_ref, g3_ref, b3_ref, m_valid[2])):
        kk = sel_ref.shape[0]
        pieces = [jnp.dot(sel_ref[b], a, preferred_element_type=jnp.float32)
                  for b in range(kk)]
        patches = jnp.concatenate(pieces, axis=1)          # (m_pad, kk*Cprev)
        y = jnp.dot(patches, w_ref[...], preferred_element_type=jnp.float32)
        a = _bn_relu(y, g_ref, b_ref, mv)

    # ---- head (specialized for s3 == 1): single matmul + bias ---------------
    q = jnp.dot(a, wh_ref[...], preferred_element_type=jnp.float32) + bh_ref[...]
    out_ref[...] = q[:batch, :]


# ----------------------------------------------------------------------------
# One-time (init) preprocessing: stacked weights + 0/1 selection matrices
# ----------------------------------------------------------------------------
def uniform_init(key, shape, fan_in):
    bound = float(1.0 / np.sqrt(fan_in))
    return jax.random.uniform(key, shape, jnp.float32, -bound, bound)


def init_dqn_params(key, h, w, outputs, kernel_size, stride, grey_scale=False):
    """Raw parameters in PyTorch layouts (conv OIHW, head (out, in)).

    Conv biases are omitted: with training-mode BatchNorm right after each conv
    the bias is exactly cancelled by the mean subtraction, so the forward output
    is identical to the PyTorch module's.
    """
    cin = 1 if grey_scale else 3
    chans = [cin, 16, 32, 32]
    keys = jax.random.split(key, 5)
    params = {}
    for li in range(3):
        c_in, c_out = chans[li], chans[li + 1]
        fan_in = c_in * kernel_size * kernel_size
        params[f"conv{li + 1}_w"] = uniform_init(
            keys[li], (c_out, c_in, kernel_size, kernel_size), fan_in)
        params[f"bn{li + 1}_gamma"] = jnp.ones((c_out,), jnp.float32)
        params[f"bn{li + 1}_beta"] = jnp.zeros((c_out,), jnp.float32)
    convw = conv2d_size_out(conv2d_size_out(conv2d_size_out(
        w, kernel_size, stride), kernel_size, stride), kernel_size, stride)
    convh = conv2d_size_out(conv2d_size_out(conv2d_size_out(
        h, kernel_size, stride), kernel_size, stride), kernel_size, stride)
    lin_in = convw * convh * 32
    params["head_w"] = uniform_init(keys[3], (outputs, lin_in), lin_in)
    params["head_b"] = uniform_init(keys[4], (outputs,), lin_in)
    return params


def prepare_dqn(params, batch, h, w, outputs, kernel_size, stride, grey_scale=False):
    """Hoisted parameter/layout prep (runs once, outside the traced forward)."""
    k, s = kernel_size, stride
    cin = 1 if grey_scale else 3
    chans = [cin, 16, 32, 32]

    oh = [h, 0, 0, 0]
    ow = [w, 0, 0, 0]
    for li in range(1, 4):
        oh[li] = conv2d_size_out(oh[li - 1], k, s)
        ow[li] = conv2d_size_out(ow[li - 1], k, s)
    m = [batch * oh[li] * ow[li] for li in range(4)]
    m_pad = [_round_up(mm, 8) for mm in m]

    def stacked_weight(wt):
        # torch (Cout, Cin, k, k) -> (k, k, Cin, Cout) -> (k*k*Cin, Cout):
        # row index = (di*k + dj)*Cin + cin, matching the lane-concat patch layout.
        c_out, c_in = wt.shape[0], wt.shape[1]
        return jnp.transpose(wt, (2, 3, 1, 0)).reshape(k * k * c_in, c_out)

    def sel_matrices(li):
        # 0/1 gather matrices: sel[b] @ a_{li-1} == rows of a_{li-1} needed by
        # kernel tap b of conv li.  Padded output rows (q >= m[li]) and padded
        # input columns (p >= m[li-1]) are all-zero, so padded-row garbage never
        # propagates and padded conv outputs stay exactly zero.
        sel = np.zeros((k * k, m_pad[li], m_pad[li - 1]), np.float32)
        sp_in = oh[li - 1] * ow[li - 1]
        sp_out = oh[li] * ow[li]
        for di in range(k):
            for dj in range(k):
                b = di * k + dj
                for q in range(m[li]):
                    n_img, rem = divmod(q, sp_out)
                    r, c = divmod(rem, ow[li])
                    p = n_img * sp_in + (s * r + di) * ow[li - 1] + (s * c + dj)
                    sel[b, q, p] = 1.0
        return jnp.asarray(sel)

    op_args = [stacked_weight(params["conv1_w"]),
               params["bn1_gamma"].reshape(1, -1),
               params["bn1_beta"].reshape(1, -1)]
    for li in (2, 3):
        op_args += [sel_matrices(li),
                    stacked_weight(params[f"conv{li}_w"]),
                    params[f"bn{li}_gamma"].reshape(1, -1),
                    params[f"bn{li}_beta"].reshape(1, -1)]

    s3 = oh[3] * ow[3]
    # TODO(synk): general s3 > 1 would need a spatial-gather stage for the head
    # (same sel-matmul pattern as conv2/conv3); this config gives s3 == 1.
    assert s3 == 1, "head specialization requires a 1x1 conv3 output"
    # With s3 == 1, torch's NCHW flatten is just the channel vector.
    op_args += [jnp.transpose(params["head_w"]),            # (C3, outputs)
                params["head_b"].reshape(1, -1)]

    flops = 2 * (m_pad[1] * (k * k * chans[0]) * chans[1]
                 + k * k * m_pad[2] * m_pad[1] * chans[1]
                 + m_pad[2] * (k * k * chans[1]) * chans[2]
                 + k * k * m_pad[3] * m_pad[2] * chans[2]
                 + m_pad[3] * (k * k * chans[2]) * chans[3]
                 + m_pad[3] * chans[3] * outputs)
    bytes_accessed = 4 * (m_pad[1] * k * k * chans[0]
                          + sum(int(np.prod(a.shape)) for a in op_args)
                          + batch * outputs)

    static = dict(k=k, s=s, cin=cin, outputs=outputs, batch=batch,
                  oh1=oh[1], ow1=ow[1], m1_pad=m_pad[1],
                  m_valid=(m[1], m[2], m[3]),
                  flops=int(flops), bytes_accessed=int(bytes_accessed))
    return op_args, static


# ----------------------------------------------------------------------------
# Forward wrapper: conv1 im2col hoisted to XLA + ONE pallas_call
# ----------------------------------------------------------------------------
def dqn_forward(op_args, static, x_nchw):
    n = x_nchw.shape[0]
    assert n == static["batch"], "batch size is baked into the prepared tables"
    k, s = static["k"], static["s"]
    oh1, ow1, cin = static["oh1"], static["ow1"], static["cin"]

    # conv1 im2col in the wrapper (tiny static strided slices; XLA handles it):
    # (N, Cin, H, W) -> (m1_pad, k*k*Cin), zero-padded rows beyond N*OH1*OW1.
    x = jnp.transpose(x_nchw, (0, 2, 3, 1)).astype(jnp.float32)   # (N,H,W,Cin)
    pieces = [x[:, di:di + s * (oh1 - 1) + 1:s, dj:dj + s * (ow1 - 1) + 1:s, :]
              for di in range(k) for dj in range(k)]
    p1 = jnp.concatenate(pieces, axis=-1).reshape(n * oh1 * ow1, k * k * cin)
    p1 = jnp.pad(p1, ((0, static["m1_pad"] - n * oh1 * ow1), (0, 0)))

    kernel = functools.partial(_dqn_fused_kernel,
                               m_valid=static["m_valid"], batch=n)
    vmem = pl.BlockSpec(memory_space=pltpu.MemorySpace.VMEM)
    return pl.pallas_call(
        kernel,
        out_shape=jax.ShapeDtypeStruct((n, static["outputs"]), jnp.float32),
        in_specs=[vmem] * (1 + len(op_args)),
        out_specs=vmem,
        compiler_params=pltpu.CompilerParams(vmem_limit_bytes=32 * 1024 * 1024),
        cost_estimate=pl.CostEstimate(flops=static["flops"],
                                      transcendentals=96,
                                      bytes_accessed=static["bytes_accessed"]),
    )(p1, *op_args)


# ----------------------------------------------------------------------------
# Pure-JAX reference (sanity check only)
# ----------------------------------------------------------------------------
def dqn_reference(params, x_nchw, kernel_size, stride):
    x = x_nchw.astype(jnp.float32)
    hi = jax.lax.Precision.HIGHEST
    for li in range(1, 4):
        y = jax.lax.conv_general_dilated(
            x, params[f"conv{li}_w"], window_strides=(stride, stride),
            padding="VALID", dimension_numbers=("NCHW", "OIHW", "NCHW"),
            precision=hi)
        mean = jnp.mean(y, axis=(0, 2, 3), keepdims=True)
        var = jnp.mean((y - mean) ** 2, axis=(0, 2, 3), keepdims=True)
        y = (y - mean) * jax.lax.rsqrt(var + BN_EPS)
        y = (y * params[f"bn{li}_gamma"].reshape(1, -1, 1, 1)
             + params[f"bn{li}_beta"].reshape(1, -1, 1, 1))
        x = jnp.maximum(y, 0.0)
    feat = x.reshape(x.shape[0], -1)
    return jnp.dot(feat, params["head_w"].T, precision=hi) + params["head_b"]


# ----------------------------------------------------------------------------
if __name__ == "__main__":
    # Config consistent with the module: h = w = 16, kernel_size = 3, stride = 2,
    # RGB input (grey_scale=False), 4 actions, batch = 2.
    H = W = 16
    KERNEL_SIZE = 3
    STRIDE = 2
    OUTPUTS = 4
    BATCH = 2
    GREY = False

    key = jax.random.PRNGKey(0)
    pkey, xkey = jax.random.split(key)
    params = init_dqn_params(pkey, H, W, OUTPUTS, KERNEL_SIZE, STRIDE,
                             grey_scale=GREY)
    x = jax.random.normal(xkey, (BATCH, 3, H, W), jnp.float32)   # NCHW like torch

    # Hoisted, one-time prep (stacked weights + 0/1 selection matrices).
    op_args, static = prepare_dqn(params, BATCH, H, W, OUTPUTS,
                                  KERNEL_SIZE, STRIDE, grey_scale=GREY)

    fwd = jax.jit(lambda ops, xx: dqn_forward(ops, static, xx))
    q_values = fwd(op_args, x)
    jax.block_until_ready(q_values)
    assert q_values.shape == (BATCH, OUTPUTS)

    # Tightened sanity check vs. a plain-JAX reference of the same math
    # (f32 throughout -> discrepancies should be ~1e-5; real bugs are O(0.1+)).
    q_ref = dqn_reference(params, x, KERNEL_SIZE, STRIDE)
    err = float(jnp.max(jnp.abs(q_values - q_ref)))
    assert err < 1e-3, f"mismatch vs reference: {err}"

    print("KERNEL_OK")
</pallas_src>

<mosaic_0001>
module attributes {stable_mosaic.version = 11 : i64} {
  func.func @_dqn_fused_kernel(%arg0: memref<104x27xf32, #tpu.memory_space<vmem>>, %arg1: memref<27x16xf32, #tpu.memory_space<vmem>>, %arg2: memref<1x16xf32, #tpu.memory_space<vmem>>, %arg3: memref<1x16xf32, #tpu.memory_space<vmem>>, %arg4: memref<9x24x104xf32, #tpu.memory_space<vmem>>, %arg5: memref<144x32xf32, #tpu.memory_space<vmem>>, %arg6: memref<1x32xf32, #tpu.memory_space<vmem>>, %arg7: memref<1x32xf32, #tpu.memory_space<vmem>>, %arg8: memref<9x8x24xf32, #tpu.memory_space<vmem>>, %arg9: memref<288x32xf32, #tpu.memory_space<vmem>>, %arg10: memref<1x32xf32, #tpu.memory_space<vmem>>, %arg11: memref<1x32xf32, #tpu.memory_space<vmem>>, %arg12: memref<32x4xf32, #tpu.memory_space<vmem>>, %arg13: memref<1x4xf32, #tpu.memory_space<vmem>>, %arg14: memref<2x4xf32, #tpu.memory_space<vmem>>) attributes {dimension_semantics = [], scalar_prefetch = 0 : i64, scratch_operands = 0 : i64, tpu.core_type = #tpu.core_type<tc>} {
    %c0 = arith.constant 0 : index
    %c0_0 = arith.constant 0 : index
    %0 = vector.load %arg0[%c0, %c0_0] : memref<104x27xf32, #tpu.memory_space<vmem>>, vector<104x27xf32>
    %c0_1 = arith.constant 0 : index
    %c0_2 = arith.constant 0 : index
    %1 = vector.load %arg1[%c0_1, %c0_2] : memref<27x16xf32, #tpu.memory_space<vmem>>, vector<27x16xf32>
    %cst = arith.constant dense<0.000000e+00> : vector<104x16xf32>
    %2 = tpu.matmul %0, %1, %cst {dimension_numbers = #tpu.dot_dimension_numbers<[1], [0], [0], [1], [0, 0, 1, 1], [], []>} : vector<104x27xf32>, vector<27x16xf32>, vector<104x16xf32> -> vector<104x16xf32>
    %3 = tpu.iota {dimensions = array<i32: 0>} : vector<104x1xi32>
    %c98_i32 = arith.constant 98 : i32
    %4 = vector.broadcast %c98_i32 : i32 to vector<104x1xi32>
    %5 = arith.cmpi slt, %3, %4 : vector<104x1xi32>
    %6 = arith.extui %5 : vector<104x1xi1> to vector<104x1xi32>
    %7 = arith.sitofp %6 : vector<104x1xi32> to vector<104x1xf32>
    %8 = vector.broadcast %7 : vector<104x1xf32> to vector<104x16xf32>
    %9 = arith.mulf %2, %8 : vector<104x16xf32>
    %cst_3 = arith.constant dense<0.000000e+00> : vector<16xf32>
    %10 = vector.multi_reduction <add>, %9, %cst_3 [0] : vector<104x16xf32> to vector<16xf32>
    %11 = vector.shape_cast %10 : vector<16xf32> to vector<1x16xf32>
    %cst_4 = arith.constant 0.0102040814 : f32
    %12 = vector.broadcast %cst_4 : f32 to vector<1x16xf32>
    %13 = arith.mulf %11, %12 : vector<1x16xf32>
    %14 = vector.broadcast %13 : vector<1x16xf32> to vector<104x16xf32>
    %15 = arith.subf %2, %14 : vector<104x16xf32>
    %16 = vector.broadcast %7 : vector<104x1xf32> to vector<104x16xf32>
    %17 = arith.mulf %15, %16 : vector<104x16xf32>
    %18 = arith.mulf %17, %17 : vector<104x16xf32>
    %cst_5 = arith.constant dense<0.000000e+00> : vector<16xf32>
    %19 = vector.multi_reduction <add>, %18, %cst_5 [0] : vector<104x16xf32> to vector<16xf32>
    %20 = vector.shape_cast %19 : vector<16xf32> to vector<1x16xf32>
    %cst_6 = arith.constant 0.0102040814 : f32
    %21 = vector.broadcast %cst_6 : f32 to vector<1x16xf32>
    %22 = arith.mulf %20, %21 : vector<1x16xf32>
    %c0_7 = arith.constant 0 : index
    %c0_8 = arith.constant 0 : index
    %23 = vector.load %arg2[%c0_7, %c0_8] : memref<1x16xf32, #tpu.memory_space<vmem>>, vector<1x16xf32>
    %cst_9 = arith.constant 9.99999974E-6 : f32
    %24 = vector.broadcast %cst_9 : f32 to vector<1x16xf32>
    %25 = arith.addf %22, %24 : vector<1x16xf32>
    %26 = math.rsqrt %25 : vector<1x16xf32>
    %27 = arith.mulf %23, %26 : vector<1x16xf32>
    %c0_10 = arith.constant 0 : index
    %c0_11 = arith.constant 0 : index
    %28 = vector.load %arg3[%c0_10, %c0_11] : memref<1x16xf32, #tpu.memory_space<vmem>>, vector<1x16xf32>
    %29 = arith.mulf %13, %27 : vector<1x16xf32>
    %30 = arith.subf %28, %29 : vector<1x16xf32>
    %31 = vector.broadcast %27 : vector<1x16xf32> to vector<104x16xf32>
    %32 = arith.mulf %2, %31 : vector<104x16xf32>
    %33 = vector.broadcast %30 : vector<1x16xf32> to vector<104x16xf32>
    %34 = arith.addf %32, %33 : vector<104x16xf32>
    %cst_12 = arith.constant 0.000000e+00 : f32
    %35 = vector.broadcast %cst_12 : f32 to vector<104x16xf32>
    %36 = arith.maximumf %34, %35 : vector<104x16xf32>
    %c0_13 = arith.constant 0 : index
    %c0_14 = arith.constant 0 : index
    %c0_15 = arith.constant 0 : index
    %37 = vector.load %arg4[%c0_13, %c0_14, %c0_15] : memref<9x24x104xf32, #tpu.memory_space<vmem>>, vector<1x24x104xf32>
    %38 = vector.shape_cast %37 : vector<1x24x104xf32> to vector<24x104xf32>
    %cst_16 = arith.constant dense<0.000000e+00> : vector<24x16xf32>
    %39 = tpu.matmul %38, %36, %cst_16 {dimension_numbers = #tpu.dot_dimension_numbers<[1], [0], [0], [1], [0, 0, 1, 1], [], []>} : vector<24x104xf32>, vector<104x16xf32>, vector<24x16xf32> -> vector<24x16xf32>
    %c1 = arith.constant 1 : index
    %c0_17 = arith.constant 0 : index
    %c0_18 = arith.constant 0 : index
    %40 = vector.load %arg4[%c1, %c0_17, %c0_18] : memref<9x24x104xf32, #tpu.memory_space<vmem>>, vector<1x24x104xf32>
    %41 = vector.shape_cast %40 : vector<1x24x104xf32> to vector<24x104xf32>
    %cst_19 = arith.constant dense<0.000000e+00> : vector<24x16xf32>
    %42 = tpu.matmul %41, %36, %cst_19 {dimension_numbers = #tpu.dot_dimension_numbers<[1], [0], [0], [1], [0, 0, 1, 1], [], []>} : vector<24x104xf32>, vector<104x16xf32>, vector<24x16xf32> -> vector<24x16xf32>
    %c2 = arith.constant 2 : index
    %c0_20 = arith.constant 0 : index
    %c0_21 = arith.constant 0 : index
    %43 = vector.load %arg4[%c2, %c0_20, %c0_21] : memref<9x24x104xf32, #tpu.memory_space<vmem>>, vector<1x24x104xf32>
    %44 = vector.shape_cast %43 : vector<1x24x104xf32> to vector<24x104xf32>
    %cst_22 = arith.constant dense<0.000000e+00> : vector<24x16xf32>
    %45 = tpu.matmul %44, %36, %cst_22 {dimension_numbers = #tpu.dot_dimension_numbers<[1], [0], [0], [1], [0, 0, 1, 1], [], []>} : vector<24x104xf32>, vector<104x16xf32>, vector<24x16xf32> -> vector<24x16xf32>
    %c3 = arith.constant 3 : index
    %c0_23 = arith.constant 0 : index
    %c0_24 = arith.constant 0 : index
    %46 = vector.load %arg4[%c3, %c0_23, %c0_24] : memref<9x24x104xf32, #tpu.memory_space<vmem>>, vector<1x24x104xf32>
    %47 = vector.shape_cast %46 : vector<1x24x104xf32> to vector<24x104xf32>
    %cst_25 = arith.constant dense<0.000000e+00> : vector<24x16xf32>
    %48 = tpu.matmul %47, %36, %cst_25 {dimension_numbers = #tpu.dot_dimension_numbers<[1], [0], [0], [1], [0, 0, 1, 1], [], []>} : vector<24x104xf32>, vector<104x16xf32>, vector<24x16xf32> -> vector<24x16xf32>
    %c4 = arith.constant 4 : index
    %c0_26 = arith.constant 0 : index
    %c0_27 = arith.constant 0 : index
    %49 = vector.load %arg4[%c4, %c0_26, %c0_27] : memref<9x24x104xf32, #tpu.memory_space<vmem>>, vector<1x24x104xf32>
    %50 = vector.shape_cast %49 : vector<1x24x104xf32> to vector<24x104xf32>
    %cst_28 = arith.constant dense<0.000000e+00> : vector<24x16xf32>
    %51 = tpu.matmul %50, %36, %cst_28 {dimension_numbers = #tpu.dot_dimension_numbers<[1], [0], [0], [1], [0, 0, 1, 1], [], []>} : vector<24x104xf32>, vector<104x16xf32>, vector<24x16xf32> -> vector<24x16xf32>
    %c5 = arith.constant 5 : index
    %c0_29 = arith.constant 0 : index
    %c0_30 = arith.constant 0 : index
    %52 = vector.load %arg4[%c5, %c0_29, %c0_30] : memref<9x24x104xf32, #tpu.memory_space<vmem>>, vector<1x24x104xf32>
    %53 = vector.shape_cast %52 : vector<1x24x104xf32> to vector<24x104xf32>
    %cst_31 = arith.constant dense<0.000000e+00> : vector<24x16xf32>
    %54 = tpu.matmul %53, %36, %cst_31 {dimension_numbers = #tpu.dot_dimension_numbers<[1], [0], [0], [1], [0, 0, 1, 1], [], []>} : vector<24x104xf32>, vector<104x16xf32>, vector<24x16xf32> -> vector<24x16xf32>
    %c6 = arith.constant 6 : index
    %c0_32 = arith.constant 0 : index
    %c0_33 = arith.constant 0 : index
    %55 = vector.load %arg4[%c6, %c0_32, %c0_33] : memref<9x24x104xf32, #tpu.memory_space<vmem>>, vector<1x24x104xf32>
    %56 = vector.shape_cast %55 : vector<1x24x104xf32> to vector<24x104xf32>
    %cst_34 = arith.constant dense<0.000000e+00> : vector<24x16xf32>
    %57 = tpu.matmul %56, %36, %cst_34 {dimension_numbers = #tpu.dot_dimension_numbers<[1], [0], [0], [1], [0, 0, 1, 1], [], []>} : vector<24x104xf32>, vector<104x16xf32>, vector<24x16xf32> -> vector<24x16xf32>
    %c7 = arith.constant 7 : index
    %c0_35 = arith.constant 0 : index
    %c0_36 = arith.constant 0 : index
    %58 = vector.load %arg4[%c7, %c0_35, %c0_36] : memref<9x24x104xf32, #tpu.memory_space<vmem>>, vector<1x24x104xf32>
    %59 = vector.shape_cast %58 : vector<1x24x104xf32> to vector<24x104xf32>
    %cst_37 = arith.constant dense<0.000000e+00> : vector<24x16xf32>
    %60 = tpu.matmul %59, %36, %cst_37 {dimension_numbers = #tpu.dot_dimension_numbers<[1], [0], [0], [1], [0, 0, 1, 1], [], []>} : vector<24x104xf32>, vector<104x16xf32>, vector<24x16xf32> -> vector<24x16xf32>
    %c8 = arith.constant 8 : index
    %c0_38 = arith.constant 0 : index
    %c0_39 = arith.constant 0 : index
    %61 = vector.load %arg4[%c8, %c0_38, %c0_39] : memref<9x24x104xf32, #tpu.memory_space<vmem>>, vector<1x24x104xf32>
    %62 = vector.shape_cast %61 : vector<1x24x104xf32> to vector<24x104xf32>
    %cst_40 = arith.constant dense<0.000000e+00> : vector<24x16xf32>
    %63 = tpu.matmul %62, %36, %cst_40 {dimension_numbers = #tpu.dot_dimension_numbers<[1], [0], [0], [1], [0, 0, 1, 1], [], []>} : vector<24x104xf32>, vector<104x16xf32>, vector<24x16xf32> -> vector<24x16xf32>
    %64 = tpu.concatenate %39, %42, %45, %48, %51, %54, %57, %60, %63 in 1 : vector<24x16xf32>, vector<24x16xf32>, vector<24x16xf32>, vector<24x16xf32>, vector<24x16xf32>, vector<24x16xf32>, vector<24x16xf32>, vector<24x16xf32>, vector<24x16xf32> -> vector<24x144xf32>
    %c0_41 = arith.constant 0 : index
    %c0_42 = arith.constant 0 : index
    %65 = vector.load %arg5[%c0_41, %c0_42] : memref<144x32xf32, #tpu.memory_space<vmem>>, vector<144x32xf32>
    %cst_43 = arith.constant dense<0.000000e+00> : vector<24x32xf32>
    %66 = tpu.matmul %64, %65, %cst_43 {dimension_numbers = #tpu.dot_dimension_numbers<[1], [0], [0], [1], [0, 0, 1, 1], [], []>} : vector<24x144xf32>, vector<144x32xf32>, vector<24x32xf32> -> vector<24x32xf32>
    %67 = tpu.iota {dimensions = array<i32: 0>} : vector<24x1xi32>
    %c18_i32 = arith.constant 18 : i32
    %68 = vector.broadcast %c18_i32 : i32 to vector<24x1xi32>
    %69 = arith.cmpi slt, %67, %68 : vector<24x1xi32>
    %70 = arith.extui %69 : vector<24x1xi1> to vector<24x1xi32>
    %71 = arith.sitofp %70 : vector<24x1xi32> to vector<24x1xf32>
    %72 = vector.broadcast %71 : vector<24x1xf32> to vector<24x32xf32>
    %73 = arith.mulf %66, %72 : vector<24x32xf32>
    %cst_44 = arith.constant dense<0.000000e+00> : vector<32xf32>
    %74 = vector.multi_reduction <add>, %73, %cst_44 [0] : vector<24x32xf32> to vector<32xf32>
    %75 = vector.shape_cast %74 : vector<32xf32> to vector<1x32xf32>
    %cst_45 = arith.constant 0.055555556 : f32
    %76 = vector.broadcast %cst_45 : f32 to vector<1x32xf32>
    %77 = arith.mulf %75, %76 : vector<1x32xf32>
    %78 = vector.broadcast %77 : vector<1x32xf32> to vector<24x32xf32>
    %79 = arith.subf %66, %78 : vector<24x32xf32>
    %80 = vector.broadcast %71 : vector<24x1xf32> to vector<24x32xf32>
    %81 = arith.mulf %79, %80 : vector<24x32xf32>
    %82 = arith.mulf %81, %81 : vector<24x32xf32>
    %cst_46 = arith.constant dense<0.000000e+00> : vector<32xf32>
    %83 = vector.multi_reduction <add>, %82, %cst_46 [0] : vector<24x32xf32> to vector<32xf32>
    %84 = vector.shape_cast %83 : vector<32xf32> to vector<1x32xf32>
    %cst_47 = arith.constant 0.055555556 : f32
    %85 = vector.broadcast %cst_47 : f32 to vector<1x32xf32>
    %86 = arith.mulf %84, %85 : vector<1x32xf32>
    %c0_48 = arith.constant 0 : index
    %c0_49 = arith.constant 0 : index
    %87 = vector.load %arg6[%c0_48, %c0_49] : memref<1x32xf32, #tpu.memory_space<vmem>>, vector<1x32xf32>
    %cst_50 = arith.constant 9.99999974E-6 : f32
    %88 = vector.broadcast %cst_50 : f32 to vector<1x32xf32>
    %89 = arith.addf %86, %88 : vector<1x32xf32>
    %90 = math.rsqrt %89 : vector<1x32xf32>
    %91 = arith.mulf %87, %90 : vector<1x32xf32>
    %c0_51 = arith.constant 0 : index
    %c0_52 = arith.constant 0 : index
    %92 = vector.load %arg7[%c0_51, %c0_52] : memref<1x32xf32, #tpu.memory_space<vmem>>, vector<1x32xf32>
    %93 = arith.mulf %77, %91 : vector<1x32xf32>
    %94 = arith.subf %92, %93 : vector<1x32xf32>
    %95 = vector.broadcast %91 : vector<1x32xf32> to vector<24x32xf32>
    %96 = arith.mulf %66, %95 : vector<24x32xf32>
    %97 = vector.broadcast %94 : vector<1x32xf32> to vector<24x32xf32>
    %98 = arith.addf %96, %97 : vector<24x32xf32>
    %cst_53 = arith.constant 0.000000e+00 : f32
    %99 = vector.broadcast %cst_53 : f32 to vector<24x32xf32>
    %100 = arith.maximumf %98, %99 : vector<24x32xf32>
    %c0_54 = arith.constant 0 : index
    %c0_55 = arith.constant 0 : index
    %c0_56 = arith.constant 0 : index
    %101 = vector.load %arg8[%c0_54, %c0_55, %c0_56] : memref<9x8x24xf32, #tpu.memory_space<vmem>>, vector<1x8x24xf32>
    %102 = vector.shape_cast %101 : vector<1x8x24xf32> to vector<8x24xf32>
    %cst_57 = arith.constant dense<0.000000e+00> : vector<8x32xf32>
    %103 = tpu.matmul %102, %100, %cst_57 {dimension_numbers = #tpu.dot_dimension_numbers<[1], [0], [0], [1], [0, 0, 1, 1], [], []>} : vector<8x24xf32>, vector<24x32xf32>, vector<8x32xf32> -> vector<8x32xf32>
    %c1_58 = arith.constant 1 : index
    %c0_59 = arith.constant 0 : index
    %c0_60 = arith.constant 0 : index
    %104 = vector.load %arg8[%c1_58, %c0_59, %c0_60] : memref<9x8x24xf32, #tpu.memory_space<vmem>>, vector<1x8x24xf32>
    %105 = vector.shape_cast %104 : vector<1x8x24xf32> to vector<8x24xf32>
    %cst_61 = arith.constant dense<0.000000e+00> : vector<8x32xf32>
    %106 = tpu.matmul %105, %100, %cst_61 {dimension_numbers = #tpu.dot_dimension_numbers<[1], [0], [0], [1], [0, 0, 1, 1], [], []>} : vector<8x24xf32>, vector<24x32xf32>, vector<8x32xf32> -> vector<8x32xf32>
    %c2_62 = arith.constant 2 : index
    %c0_63 = arith.constant 0 : index
    %c0_64 = arith.constant 0 : index
    %107 = vector.load %arg8[%c2_62, %c0_63, %c0_64] : memref<9x8x24xf32, #tpu.memory_space<vmem>>, vector<1x8x24xf32>
    %108 = vector.shape_cast %107 : vector<1x8x24xf32> to vector<8x24xf32>
    %cst_65 = arith.constant dense<0.000000e+00> : vector<8x32xf32>
    %109 = tpu.matmul %108, %100, %cst_65 {dimension_numbers = #tpu.dot_dimension_numbers<[1], [0], [0], [1], [0, 0, 1, 1], [], []>} : vector<8x24xf32>, vector<24x32xf32>, vector<8x32xf32> -> vector<8x32xf32>
    %c3_66 = arith.constant 3 : index
    %c0_67 = arith.constant 0 : index
    %c0_68 = arith.constant 0 : index
    %110 = vector.load %arg8[%c3_66, %c0_67, %c0_68] : memref<9x8x24xf32, #tpu.memory_space<vmem>>, vector<1x8x24xf32>
    %111 = vector.shape_cast %110 : vector<1x8x24xf32> to vector<8x24xf32>
    %cst_69 = arith.constant dense<0.000000e+00> : vector<8x32xf32>
    %112 = tpu.matmul %111, %100, %cst_69 {dimension_numbers = #tpu.dot_dimension_numbers<[1], [0], [0], [1], [0, 0, 1, 1], [], []>} : vector<8x24xf32>, vector<24x32xf32>, vector<8x32xf32> -> vector<8x32xf32>
    %c4_70 = arith.constant 4 : index
    %c0_71 = arith.constant 0 : index
    %c0_72 = arith.constant 0 : index
    %113 = vector.load %arg8[%c4_70, %c0_71, %c0_72] : memref<9x8x24xf32, #tpu.memory_space<vmem>>, vector<1x8x24xf32>
    %114 = vector.shape_cast %113 : vector<1x8x24xf32> to vector<8x24xf32>
    %cst_73 = arith.constant dense<0.000000e+00> : vector<8x32xf32>
    %115 = tpu.matmul %114, %100, %cst_73 {dimension_numbers = #tpu.dot_dimension_numbers<[1], [0], [0], [1], [0, 0, 1, 1], [], []>} : vector<8x24xf32>, vector<24x32xf32>, vector<8x32xf32> -> vector<8x32xf32>
    %c5_74 = arith.constant 5 : index
    %c0_75 = arith.constant 0 : index
    %c0_76 = arith.constant 0 : index
    %116 = vector.load %arg8[%c5_74, %c0_75, %c0_76] : memref<9x8x24xf32, #tpu.memory_space<vmem>>, vector<1x8x24xf32>
    %117 = vector.shape_cast %116 : vector<1x8x24xf32> to vector<8x24xf32>
    %cst_77 = arith.constant dense<0.000000e+00> : vector<8x32xf32>
    %118 = tpu.matmul %117, %100, %cst_77 {dimension_numbers = #tpu.dot_dimension_numbers<[1], [0], [0], [1], [0, 0, 1, 1], [], []>} : vector<8x24xf32>, vector<24x32xf32>, vector<8x32xf32> -> vector<8x32xf32>
    %c6_78 = arith.constant 6 : index
    %c0_79 = arith.constant 0 : index
    %c0_80 = arith.constant 0 : index
    %119 = vector.load %arg8[%c6_78, %c0_79, %c0_80] : memref<9x8x24xf32, #tpu.memory_space<vmem>>, vector<1x8x24xf32>
    %120 = vector.shape_cast %119 : vector<1x8x24xf32> to vector<8x24xf32>
    %cst_81 = arith.constant dense<0.000000e+00> : vector<8x32xf32>
    %121 = tpu.matmul %120, %100, %cst_81 {dimension_numbers = #tpu.dot_dimension_numbers<[1], [0], [0], [1], [0, 0, 1, 1], [], []>} : vector<8x24xf32>, vector<24x32xf32>, vector<8x32xf32> -> vector<8x32xf32>
    %c7_82 = arith.constant 7 : index
    %c0_83 = arith.constant 0 : index
    %c0_84 = arith.constant 0 : index
    %122 = vector.load %arg8[%c7_82, %c0_83, %c0_84] : memref<9x8x24xf32, #tpu.memory_space<vmem>>, vector<1x8x24xf32>
    %123 = vector.shape_cast %122 : vector<1x8x24xf32> to vector<8x24xf32>
    %cst_85 = arith.constant dense<0.000000e+00> : vector<8x32xf32>
    %124 = tpu.matmul %123, %100, %cst_85 {dimension_numbers = #tpu.dot_dimension_numbers<[1], [0], [0], [1], [0, 0, 1, 1], [], []>} : vector<8x24xf32>, vector<24x32xf32>, vector<8x32xf32> -> vector<8x32xf32>
    %c8_86 = arith.constant 8 : index
    %c0_87 = arith.constant 0 : index
    %c0_88 = arith.constant 0 : index
    %125 = vector.load %arg8[%c8_86, %c0_87, %c0_88] : memref<9x8x24xf32, #tpu.memory_space<vmem>>, vector<1x8x24xf32>
    %126 = vector.shape_cast %125 : vector<1x8x24xf32> to vector<8x24xf32>
    %cst_89 = arith.constant dense<0.000000e+00> : vector<8x32xf32>
    %127 = tpu.matmul %126, %100, %cst_89 {dimension_numbers = #tpu.dot_dimension_numbers<[1], [0], [0], [1], [0, 0, 1, 1], [], []>} : vector<8x24xf32>, vector<24x32xf32>, vector<8x32xf32> -> vector<8x32xf32>
    %128 = tpu.concatenate %103, %106, %109, %112, %115, %118, %121, %124, %127 in 1 : vector<8x32xf32>, vector<8x32xf32>, vector<8x32xf32>, vector<8x32xf32>, vector<8x32xf32>, vector<8x32xf32>, vector<8x32xf32>, vector<8x32xf32>, vector<8x32xf32> -> vector<8x288xf32>
    %c0_90 = arith.constant 0 : index
    %c0_91 = arith.constant 0 : index
    %129 = vector.load %arg9[%c0_90, %c0_91] : memref<288x32xf32, #tpu.memory_space<vmem>>, vector<288x32xf32>
    %cst_92 = arith.constant dense<0.000000e+00> : vector<8x32xf32>
    %130 = tpu.matmul %128, %129, %cst_92 {dimension_numbers = #tpu.dot_dimension_numbers<[1], [0], [0], [1], [0, 0, 1, 1], [], []>} : vector<8x288xf32>, vector<288x32xf32>, vector<8x32xf32> -> vector<8x32xf32>
    %131 = tpu.iota {dimensions = array<i32: 0>} : vector<8x1xi32>
    %c2_i32 = arith.constant 2 : i32
    %132 = vector.broadcast %c2_i32 : i32 to vector<8x1xi32>
    %133 = arith.cmpi slt, %131, %132 : vector<8x1xi32>
    %134 = arith.extui %133 : vector<8x1xi1> to vector<8x1xi32>
    %135 = arith.sitofp %134 : vector<8x1xi32> to vector<8x1xf32>
    %136 = vector.broadcast %135 : vector<8x1xf32> to vector<8x32xf32>
    %137 = arith.mulf %130, %136 : vector<8x32xf32>
    %cst_93 = arith.constant dense<0.000000e+00> : vector<32xf32>
    %138 = vector.multi_reduction <add>, %137, %cst_93 [0] : vector<8x32xf32> to vector<32xf32>
    %139 = vector.shape_cast %138 : vector<32xf32> to vector<1x32xf32>
    %cst_94 = arith.constant 5.000000e-01 : f32
    %140 = vector.broadcast %cst_94 : f32 to vector<1x32xf32>
    %141 = arith.mulf %139, %140 : vector<1x32xf32>
    %142 = vector.broadcast %141 : vector<1x32xf32> to vector<8x32xf32>
    %143 = arith.subf %130, %142 : vector<8x32xf32>
    %144 = vector.broadcast %135 : vector<8x1xf32> to vector<8x32xf32>
    %145 = arith.mulf %143, %144 : vector<8x32xf32>
    %146 = arith.mulf %145, %145 : vector<8x32xf32>
    %cst_95 = arith.constant dense<0.000000e+00> : vector<32xf32>
    %147 = vector.multi_reduction <add>, %146, %cst_95 [0] : vector<8x32xf32> to vector<32xf32>
    %148 = vector.shape_cast %147 : vector<32xf32> to vector<1x32xf32>
    %cst_96 = arith.constant 5.000000e-01 : f32
    %149 = vector.broadcast %cst_96 : f32 to vector<1x32xf32>
    %150 = arith.mulf %148, %149 : vector<1x32xf32>
    %c0_97 = arith.constant 0 : index
    %c0_98 = arith.constant 0 : index
    %151 = vector.load %arg10[%c0_97, %c0_98] : memref<1x32xf32, #tpu.memory_space<vmem>>, vector<1x32xf32>
    %cst_99 = arith.constant 9.99999974E-6 : f32
    %152 = vector.broadcast %cst_99 : f32 to vector<1x32xf32>
    %153 = arith.addf %150, %152 : vector<1x32xf32>
    %154 = math.rsqrt %153 : vector<1x32xf32>
    %155 = arith.mulf %151, %154 : vector<1x32xf32>
    %c0_100 = arith.constant 0 : index
    %c0_101 = arith.constant 0 : index
    %156 = vector.load %arg11[%c0_100, %c0_101] : memref<1x32xf32, #tpu.memory_space<vmem>>, vector<1x32xf32>
    %157 = arith.mulf %141, %155 : vector<1x32xf32>
    %158 = arith.subf %156, %157 : vector<1x32xf32>
    %159 = vector.broadcast %155 : vector<1x32xf32> to vector<8x32xf32>
    %160 = arith.mulf %130, %159 : vector<8x32xf32>
    %161 = vector.broadcast %158 : vector<1x32xf32> to vector<8x32xf32>
    %162 = arith.addf %160, %161 : vector<8x32xf32>
    %cst_102 = arith.constant 0.000000e+00 : f32
    %163 = vector.broadcast %cst_102 : f32 to vector<8x32xf32>
    %164 = arith.maximumf %162, %163 : vector<8x32xf32>
    %c0_103 = arith.constant 0 : index
    %c0_104 = arith.constant 0 : index
    %165 = vector.load %arg12[%c0_103, %c0_104] : memref<32x4xf32, #tpu.memory_space<vmem>>, vector<32x4xf32>
    %cst_105 = arith.constant dense<0.000000e+00> : vector<8x4xf32>
    %166 = tpu.matmul %164, %165, %cst_105 {dimension_numbers = #tpu.dot_dimension_numbers<[1], [0], [0], [1], [0, 0, 1, 1], [], []>} : vector<8x32xf32>, vector<32x4xf32>, vector<8x4xf32> -> vector<8x4xf32>
    %c0_106 = arith.constant 0 : index
    %c0_107 = arith.constant 0 : index
    %167 = vector.load %arg13[%c0_106, %c0_107] : memref<1x4xf32, #tpu.memory_space<vmem>>, vector<1x4xf32>
    %168 = vector.broadcast %167 : vector<1x4xf32> to vector<8x4xf32>
    %169 = arith.addf %166, %168 : vector<8x4xf32>
    %170 = vector.extract_strided_slice %169 {offsets = [0, 0], sizes = [2, 4], strides = [1, 1]} : vector<8x4xf32> to vector<2x4xf32>
    %c0_108 = arith.constant 0 : index
    %c0_109 = arith.constant 0 : index
    %171 = vector.load %arg14[%c0_108, %c0_109] : memref<2x4xf32, #tpu.memory_space<vmem>>, vector<2x4xf32>
    tpu.vector_store %arg14[%c0_108, %c0_109], %170 {strides = array<i32>} : memref<2x4xf32, #tpu.memory_space<vmem>>, vector<2x4xf32>,
    return
  }
}

</mosaic_0001>

<bundles_post_ra>
// kernel: _lambda_.1
= control target key start
LH: loop header
LB: loop body
LE: loop exit
PB: predicated region body
PF: predicated region fallthrough
CT: control target
= control target key end

     0   :  { %vm105_vm0 = vcmask 1042432   ;;  %s2514_s0 = inlined_call_operand.vmem [shape: f32[104,27], index: 0, kind: input, shape index: {}]   ;;  %s2515_s1 = inlined_call_operand.vmem [shape: f32[27,16], index: 1, kind: input, shape index: {}]   ;;  %s2516_s2 = inlined_call_operand.vmem [shape: f32[1,16], index: 2, kind: input, shape index: {}]   ;;  %s2517_s3 = inlined_call_operand.vmem [shape: f32[1,16], index: 3, kind: input, shape index: {}]   ;;  %s2518_s4 = inlined_call_operand.vmem [shape: f32[9,24,104], index: 4, kind: input, shape index: {}]   ;;  %s2519_s5 = inlined_call_operand.vmem [shape: f32[144,32], index: 5, kind: input, shape index: {}]   ;;  %s2520_s6 = inlined_call_operand.vmem [shape: f32[1,32], index: 6, kind: input, shape index: {}]   ;;  %s2521_s7 = inlined_call_operand.vmem [shape: f32[1,32], index: 7, kind: input, shape index: {}]   ;;  %s2522_s8 = inlined_call_operand.vmem [shape: f32[9,8,24], index: 8, kind: input, shape index: {}]   ;;  %s2523_s9 = inlined_call_operand.vmem [shape: f32[288,32], index: 9, kind: input, shape index: {}]   ;;  %s2524_s10 = inlined_call_operand.vmem [shape: f32[1,32], index: 10, kind: input, shape index: {}]   ;;  %s2525_s11 = inlined_call_operand.vmem [shape: f32[1,32], index: 11, kind: input, shape index: {}]   ;;  %s2526_s12 = inlined_call_operand.vmem [shape: f32[32,4], index: 12, kind: input, shape index: {}]   ;;  %s2527_s13 = inlined_call_operand.vmem [shape: f32[1,4], index: 13, kind: input, shape index: {}]   ;;  %s2528_s14 = inlined_call_operand.hbm [shape: f32[2,4], index: 14, kind: output, shape index: {}]  }
   0x1   :  { %v64_v0 = vld [vmem:[%s2515_s1 + $0x18] sm:$0x7]  ;;  %v63_v1 = vld [vmem:[%s2515_s1 + $0x10] sm:$0xff]  ;;  %v62_v2 = vld [vmem:[%s2515_s1 + $0x8] sm:$0xff] }
   0x2   :  { %1464 = vmatpush.msk.msra.mxu0 %vm105_vm0, %v64_v0 }
   0x4   :  { %122 = vmatpush.msra.mxu0 %v63_v1 }
   0x5   :  { %19 = vsyncpa [#allocation3], 0  ;;  %v61_v3 = vld [vmem:[%s2515_s1] sm:$0xff]  ;;  %vm65_vm1 = vcmask 220160   ;;  %v49_v5 = vld [vmem:[%s2514_s0 + $0x8] sm:$0xff]  ;;  %vm231_vm2 = vcmask 130048   ;;  %v165_v32 = vlaneseq }
   0x6   :  { %123 = vmatpush.msra.mxu0 %v62_v2  ;;  %v48_v4 = vld [vmem:[%s2514_s0] sm:$0xff]  ;;  %v50_v6 = vld [vmem:[%s2514_s0 + $0x10] sm:$0xff]  ;;  %v51_v7 = vld [vmem:[%s2514_s0 + $0x18] sm:$0xff]  ;;  %v1659_v52 = vmov 0.0   ;;  %vm399_vm7 = vcmask 850944   ;;  %s1660_s24 = smov 16  }
   0x7   :  { %v52_v8 = vld [vmem:[%s2514_s0 + $0x20] sm:$0xff]  ;;  %v53_v9 = vld [vmem:[%s2514_s0 + $0x28] sm:$0xff]  ;;  %v54_v10 = vld [vmem:[%s2514_s0 + $0x30] sm:$0xff]  ;;  %v1841_v38 = vshrl.u32 %v165_v32, 7  ;;  %s1661_s25 = smov 32   ;;  %s1663_s29 = smov 64  }
   0x8   :  { %124 = vmatpush.msra.mxu0 %v61_v3  ;;  %v55_v11 = vld [vmem:[%s2514_s0 + $0x38] sm:$0xff]  ;;  %v56_v12 = vld [vmem:[%s2514_s0 + $0x40] sm:$0xff]  ;;  %v57_v13 = vld [vmem:[%s2514_s0 + $0x48] sm:$0xff]  ;;  %s1665_s30 = smov 96   ;;  %s1666_s15 = smov 112   ;;  %vm834_vm8 = vcmask 261120  }
   0x9   :  { %1465 = vmatmul.msk.f32.vlgmr.msra.gmra.mxu0 %vm65_vm1, %v48_v4  ;;  %v58_v14 = vld [vmem:[%s2514_s0 + $0x50] sm:$0xff]  ;;  %v59_v15 = vld [vmem:[%s2514_s0 + $0x58] sm:$0xff]  ;;  %v60_v16 = vld [vmem:[%s2514_s0 + $0x60] sm:$0xff]  ;;  %v178_v43 = vadd.s32 96, %v1841_v38  ;;  %s1662_s0 = smov 48   ;;  %vm838_vm9 = vcmask 392192  }
   0xa   :  { %vm842_vm10 = vcmask 523264   ;;  %vm846_vm11 = vcmask 654336   ;;  %vm850_vm12 = vcmask 785408   ;;  %vm854_vm13 = vcmask 916480   ;;  %s1667_s17 = smov [#allocation2]   ;;  %s1455_s20 = sshll.u32 %s2528_s14, 4  ;;  %s1456_s20 = int_to_ptr.hbm [resolvable:$true] %s1455_s20 }
   0xb   :  { %vm191_vm3 = vcmp.lt.s32.totalorder %v178_v43, 98 }
   0xc   :  { %v1478_v53 = vsel %vm191_vm3, 1.0, %v1659_v52  ;;  %vm1367_vm3 = vcmp.lt.s32.totalorder %v1841_v38, 2 }
  0x11   :  { %1466 = vmatmul.msk.f32.gmra.mxu0 %vm65_vm1, %v49_v5 }
  0x19   :  { %1467 = vmatmul.msk.f32.gmra.mxu0 %vm65_vm1, %v50_v6 }
  0x21   :  { %1468 = vmatmul.msk.f32.gmra.mxu0 %vm65_vm1, %v51_v7 }
  0x29   :  { %1469 = vmatmul.msk.f32.gmra.mxu0 %vm65_vm1, %v52_v8 }
  0x31   :  { %1470 = vmatmul.msk.f32.gmra.mxu0 %vm65_vm1, %v53_v9 }
  0x39   :  { %1471 = vmatmul.msk.f32.gmra.mxu0 %vm65_vm1, %v54_v10 }
  0x41   :  { %1472 = vmatmul.msk.f32.gmra.mxu0 %vm65_vm1, %v55_v11 }
  0x49   :  { %1473 = vmatmul.msk.f32.gmra.mxu0 %vm65_vm1, %v56_v12 }
  0x51   :  { %1474 = vmatmul.msk.f32.gmra.mxu0 %vm65_vm1, %v57_v13 }
  0x59   :  { %1475 = vmatmul.msk.f32.gmra.mxu0 %vm65_vm1, %v58_v14 }
  0x61   :  { %1476 = vmatmul.msk.f32.gmra.mxu0 %vm65_vm1, %v59_v15 }
  0x69   :  { %1477 = vmatmul.msk.f32.gmra.mxu0 %vm65_vm1, %v60_v16 }
  0x86   :  { %v1807_v17 = vpop.f32.mrf.mxu0 }
  0x87   :  { %v232_v28 = vsel %vm231_vm2, %v1807_v17, 0.0 }
  0x8e   :  { %v1809_v18 = vpop.f32.mrf.mxu0 }
  0x8f   :  { %v233_v27 = vsel %vm231_vm2, %v1809_v18, 0.0 }
  0x90   :  { %v234_v30 = vadd.f32 %v233_v27, %v232_v28 }
  0x96   :  { %v1811_v19 = vpop.f32.mrf.mxu0 }
  0x97   :  { %v235_v29 = vsel %vm231_vm2, %v1811_v19, 0.0 }
  0x98   :  { %v236_v33 = vadd.f32 %v235_v29, %v234_v30 }
  0x9e   :  { %v1813_v20 = vpop.f32.mrf.mxu0 }
  0x9f   :  { %v237_v31 = vsel %vm231_vm2, %v1813_v20, 0.0 }
  0xa0   :  { %v238_v36 = vadd.f32 %v237_v31, %v236_v33 }
  0xa6   :  { %v1815_v21 = vpop.f32.mrf.mxu0 }
  0xa7   :  { %v239_v35 = vsel %vm231_vm2, %v1815_v21, 0.0 }
  0xa8   :  { %v240_v39 = vadd.f32 %v239_v35, %v238_v36 }
  0xae   :  { %v1817_v22 = vpop.f32.mrf.mxu0 }
  0xaf   :  { %v241_v37 = vsel %vm231_vm2, %v1817_v22, 0.0 }
  0xb0   :  { %v242_v41 = vadd.f32 %v241_v37, %v240_v39 }
  0xb6   :  { %v1819_v23 = vpop.f32.mrf.mxu0 }
  0xb7   :  { %v243_v40 = vsel %vm231_vm2, %v1819_v23, 0.0 }
  0xb8   :  { %v244_v44 = vadd.f32 %v243_v40, %v242_v41 }
  0xbe   :  { %v1821_v24 = vpop.f32.mrf.mxu0 }
  0xbf   :  { %v245_v42 = vsel %vm231_vm2, %v1821_v24, 0.0 }
  0xc0   :  { %v246_v47 = vadd.f32 %v245_v42, %v244_v44 }
  0xc6   :  { %v1823_v25 = vpop.f32.mrf.mxu0 }
  0xc7   :  { %v247_v46 = vsel %vm231_vm2, %v1823_v25, 0.0 }
  0xc8   :  { %v248_v49 = vadd.f32 %v247_v46, %v246_v47 }
  0xce   :  { %v1825_v26 = vpop.f32.mrf.mxu0 }
  0xcf   :  { %v249_v48 = vsel %vm231_vm2, %v1825_v26, 0.0 }
  0xd0   :  { %v250_v51 = vadd.f32 %v249_v48, %v248_v49 }
  0xd6   :  { %v1835_v34 = vpop.f32.mrf.mxu0 }
  0xd7   :  { %v251_v50 = vsel %vm231_vm2, %v1835_v34, 0.0 }
  0xd8   :  { %v252_v55 = vadd.f32 %v251_v50, %v250_v51 }
  0xde   :  { %v1848_v45 = vpop.f32.mrf.mxu0 }
  0xdf   :  { %v253_v54 = vsel %vm231_vm2, %v1848_v45, 0.0 }
  0xe0   :  { %v254_v58 = vadd.f32 %v253_v54, %v252_v55 }
  0xe6   :  { %v1859_v56 = vpop.f32.mrf.mxu0 }
  0xe7   :  { %v230_v57 = vmul.f32 %v1478_v53, %v1859_v56 }
  0xe9   :  { %v255_v59 = vsel %vm231_vm2, %v230_v57, 0.0 }
  0xea   :  { %v256_v60 = vadd.f32 %v255_v59, %v254_v58 }
  0xec   :  { %v257_v61 = vrot.slane %v256_v60, 4 }
  0xee   :  { %v258_v62 = vadd.f32 %v257_v61, %v256_v60 }
  0xf0   :  { %v259_v63 = vrot.slane %v258_v62, 2 }
  0xf2   :  { %v260_v0 = vadd.f32 %v259_v63, %v258_v62 }
  0xf4   :  { %v261_v1 = vrot.slane %v260_v0, 1 }
  0xf6   :  { %v262_v2 = vadd.f32 %v261_v1, %v260_v0 }
  0xf8   :  { %v1863_v3 = vmul.f32 0.010204081, %v262_v2 }
  0xfa   :  { %v264_v4 = vsub.f32 %v1807_v17, %v1863_v3  ;;  %v265_v5 = vsub.f32 %v1809_v18, %v1863_v3  ;;  %v266_v6 = vsub.f32 %v1811_v19, %v1863_v3  ;;  %v267_v7 = vsub.f32 %v1813_v20, %v1863_v3 }
  0xfb   :  { %v268_v10 = vsub.f32 %v1815_v21, %v1863_v3  ;;  %v269_v12 = vsub.f32 %v1817_v22, %v1863_v3  ;;  %v270_v27 = vsub.f32 %v1819_v23, %v1863_v3  ;;  %v271_v31 = vsub.f32 %v1821_v24, %v1863_v3 }
  0xfc   :  { %v290_v8 = vmul.f32 %v264_v4, %v264_v4  ;;  %v291_v9 = vmul.f32 %v265_v5, %v265_v5  ;;  %v292_v11 = vmul.f32 %v266_v6, %v266_v6  ;;  %v293_v13 = vmul.f32 %v267_v7, %v267_v7 }
  0xfd   :  { %v294_v28 = vmul.f32 %v268_v10, %v268_v10  ;;  %v295_v32 = vmul.f32 %v269_v12, %v269_v12  ;;  %v272_v36 = vsub.f32 %v1823_v25, %v1863_v3  ;;  %v296_v37 = vmul.f32 %v270_v27, %v270_v27 }
  0xfe   :  { %v303_v14 = vsel %vm231_vm2, %v290_v8, 0.0  ;;  %v304_v15 = vsel %vm231_vm2, %v291_v9, 0.0  ;;  %v306_v29 = vsel %vm231_vm2, %v292_v11, 0.0  ;;  %v308_v33 = vsel %vm231_vm2, %v293_v13, 0.0 }
  0xff   :  { %v305_v16 = vadd.f32 %v304_v15, %v303_v14  ;;  %v310_v39 = vsel %vm231_vm2, %v294_v28, 0.0  ;;  %v273_v41 = vsub.f32 %v1825_v26, %v1863_v3  ;;  %v297_v42 = vmul.f32 %v271_v31, %v271_v31  ;;  %v335_v31 = vld [vmem:[%s2516_s2] sm:$0x1] }
 0x100   :  { %v312_v43 = vsel %vm231_vm2, %v295_v32, 0.0  ;;  %v274_v46 = vsub.f32 %v1835_v34, %v1863_v3  ;;  %v276_v47 = vsub.f32 %v1859_v56, %v1863_v3  ;;  %v298_v48 = vmul.f32 %v272_v36, %v272_v36  ;;  %v348_v36 = vld [vmem:[%s2517_s3] sm:$0x1] }
 0x101   :  { %v307_v30 = vadd.f32 %v306_v29, %v305_v16  ;;  %v314_v49 = vsel %vm231_vm2, %v296_v37, 0.0  ;;  %v275_v51 = vsub.f32 %v1848_v45, %v1863_v3  ;;  %v299_v54 = vmul.f32 %v273_v41, %v273_v41 }
 0x102   :  { %v316_v55 = vsel %vm231_vm2, %v297_v42, 0.0  ;;  %v289_v58 = vmul.f32 %v1478_v53, %v276_v47  ;;  %v300_v59 = vmul.f32 %v274_v46, %v274_v46  ;;  %v318_v60 = vsel %vm231_vm2, %v298_v48, 0.0 }
 0x103   :  { %v309_v35 = vadd.f32 %v308_v33, %v307_v30  ;;  %v301_v62 = vmul.f32 %v275_v51, %v275_v51  ;;  %v320_v63 = vsel %vm231_vm2, %v299_v54, 0.0 }
 0x104   :  { %v302_v1 = vmul.f32 %v289_v58, %v289_v58  ;;  %v322_v2 = vsel %vm231_vm2, %v300_v59, 0.0 }
 0x105   :  { %v311_v40 = vadd.f32 %v310_v39, %v309_v35  ;;  %v324_v5 = vsel %vm231_vm2, %v301_v62, 0.0 }
 0x106   :  { %v326_v7 = vsel %vm231_vm2, %v302_v1, 0.0 }
 0x107   :  { %v313_v44 = vadd.f32 %v312_v43, %v311_v40 }
 0x109   :  { %v315_v50 = vadd.f32 %v314_v49, %v313_v44 }
 0x10b   :  { %v317_v57 = vadd.f32 %v316_v55, %v315_v50 }
 0x10d   :  { %v319_v61 = vadd.f32 %v318_v60, %v317_v57 }
 0x10f   :  { %v321_v0 = vadd.f32 %v320_v63, %v319_v61 }
 0x111   :  { %v323_v4 = vadd.f32 %v322_v2, %v321_v0 }
 0x113   :  { %v325_v6 = vadd.f32 %v324_v5, %v323_v4 }
 0x115   :  { %v327_v8 = vadd.f32 %v326_v7, %v325_v6 }
 0x117   :  { %v328_v9 = vrot.slane %v327_v8, 4 }
 0x119   :  { %v329_v53 = vadd.f32 %v328_v9, %v327_v8  ;;  %v1482_v8 = vld [vmem:[%s2518_s4 + $0x18] sm:$0xff]  ;;  %v396_v9 = vld [vmem:[%s2518_s4] sm:$0xff] }
 0x11b   :  { %v330_v10 = vrot.slane %v329_v53, 2 }
 0x11d   :  { %v331_v11 = vadd.f32 %v330_v10, %v329_v53  ;;  %v1483_v53 = vld [vmem:[%s2518_s4 + $0x20] sm:$0xff]  ;;  %v1488_v10 = vld [vmem:[%s2518_s4 + $0x30] sm:$0xff] }
 0x11f   :  { %v332_v12 = vrot.slane %v331_v11, 1 }
 0x121   :  { %v333_v13 = vadd.f32 %v332_v12, %v331_v11  ;;  %v397_v11 = vld [vmem:[%s2518_s4 + $0x8] sm:$0xff] }
 0x122   :  { %v1484_v12 = vld [vmem:[%s2518_s4 + $0x28] sm:$0xff] }
 0x123   :  { %v334_v14 = vmul.f32 0.010204081, %v333_v13  ;;  %v1489_v13 = vld [vmem:[%s2518_s4 + $0x38] sm:$0xff] }
 0x125   :  { %v336_v15 = vadd.f32 1e-05, %v334_v14  ;;  %v398_v14 = vld [vmem:[%s2518_s4 + $0x10] sm:$0xff] }
 0x127   :  { %1627 = vrsqrt.f32 %v336_v15  ;;  %vm343_vm5 = vweird.f32 %v336_v15 }
 0x12d   :  { %v1628_v16 = vpop.eup %1627 }
 0x12e   :  { %v338_v27 = vmul.f32 %v1628_v16, %v336_v15  ;;  %vm344_vm4 = vweird.f32 %v1628_v16  ;;  %v1494_v15 = vld [vmem:[%s2518_s4 + $0x48] sm:$0xff] }
 0x12f   :  { %vm345_vm6 = vmor %vm343_vm5, %vm344_vm4 }
 0x130   :  { %v339_v28 = vmul.f32 %v1628_v16, %v338_v27  ;;  %v1490_v27 = vld [vmem:[%s2518_s4 + $0x40] sm:$0xff] }
 0x132   :  { %v340_v29 = vmul.f32 0.5, %v339_v28  ;;  %v1495_v28 = vld [vmem:[%s2518_s4 + $0x50] sm:$0xff] }
 0x134   :  { %v341_v30 = vsub.f32 1.5, %v340_v29  ;;  %v1501_v29 = vld [vmem:[%s2518_s4 + $0x68] sm:$0xff] }
 0x136   :  { %v342_v32 = vmul.f32 %v1628_v16, %v341_v30  ;;  %v1506_v30 = vld [vmem:[%s2518_s4 + $0x78] sm:$0xff] }
 0x138   :  { %v346_v33 = vsel %vm345_vm6, %v1628_v16, %v342_v32  ;;  %v1500_v16 = vld [vmem:[%s2518_s4 + $0x60] sm:$0xff]  ;;  %v1496_v32 = vld [vmem:[%s2518_s4 + $0x58] sm:$0xff] }
 0x139   :  { %v347_v35 = vmul.f32 %v346_v33, %v335_v31  ;;  %v1502_v31 = vld [vmem:[%s2518_s4 + $0x70] sm:$0xff]  ;;  %v1507_v33 = vld [vmem:[%s2518_s4 + $0x80] sm:$0xff] }
 0x13b   :  { %v349_v37 = vmul.f32 %v347_v35, %v1863_v3  ;;  %v1911_v39 = vperm.slane %v347_v35, 0  ;;  %v1512_v35 = vld [vmem:[%s2518_s4 + $0x90] sm:$0xff] }
 0x13d   :  { %v350_v40 = vsub.f32 %v348_v36, %v349_v37  ;;  %v366_v41 = vmul.f32 %v1911_v39, %v1859_v56  ;;  %v365_v43 = vmul.f32 %v1911_v39, %v1848_v45  ;;  %v364_v47 = vmul.f32 %v1911_v39, %v1835_v34  ;;  %v1518_v36 = vld [vmem:[%s2518_s4 + $0xa8] sm:$0xff] }
 0x13e   :  { %v363_v49 = vmul.f32 %v1911_v39, %v1825_v26  ;;  %v362_v50 = vmul.f32 %v1911_v39, %v1823_v25  ;;  %v361_v51 = vmul.f32 %v1911_v39, %v1821_v24  ;;  %v360_v55 = vmul.f32 %v1911_v39, %v1819_v23  ;;  %v1508_v37 = vld [vmem:[%s2518_s4 + $0x88] sm:$0xff] }
 0x13f   :  { %v1915_v42 = vperm.slane %v350_v40, 0  ;;  %v359_v58 = vmul.f32 %v1911_v39, %v1817_v22  ;;  %v358_v60 = vmul.f32 %v1911_v39, %v1815_v21  ;;  %v357_v62 = vmul.f32 %v1911_v39, %v1813_v20  ;;  %v1519_v40 = vld [vmem:[%s2518_s4 + $0xb0] sm:$0xff] }
 0x140   :  { %v356_v0 = vmul.f32 %v1911_v39, %v1811_v19  ;;  %v355_v2 = vmul.f32 %v1911_v39, %v1809_v18  ;;  %v354_v5 = vmul.f32 %v1911_v39, %v1807_v17  ;;  %v1513_v39 = vld [vmem:[%s2518_s4 + $0x98] sm:$0xff] }
 0x141   :  { %v382_v44 = vadd.f32 %v1915_v42, %v366_v41  ;;  %v381_v46 = vadd.f32 %v1915_v42, %v365_v43  ;;  %v380_v3 = vadd.f32 %v1915_v42, %v364_v47  ;;  %v379_v45 = vadd.f32 %v1915_v42, %v363_v49  ;;  %v1520_v41 = vld [vmem:[%s2518_s4 + $0xb8] sm:$0xff]  ;;  %v1524_v49 = vld [vmem:[%s2518_s4 + $0xc0] sm:$0xff] }
 0x142   :  { %v378_v26 = vadd.f32 %v1915_v42, %v362_v50  ;;  %v377_v54 = vadd.f32 %v1915_v42, %v361_v51  ;;  %v376_v57 = vadd.f32 %v1915_v42, %v360_v55  ;;  %v375_v59 = vadd.f32 %v1915_v42, %v359_v58  ;;  %v1525_v51 = vld [vmem:[%s2518_s4 + $0xc8] sm:$0xff] }
 0x143   :  { %v1923_v48 = vmax.f32 %v382_v44, 0.0  ;;  %v1930_v56 = vmax.f32 %v381_v46, 0.0  ;;  %v1938_v34 = vmax.f32 %v380_v3, 0.0  ;;  %v1946_v25 = vmax.f32 %v379_v45, 0.0 }
 0x144   :  { %v1954_v24 = vmax.f32 %v378_v26, 0.0  ;;  %v1962_v23 = vmax.f32 %v377_v54, 0.0  ;;  %v1970_v22 = vmax.f32 %v376_v57, 0.0  ;;  %v374_v61 = vadd.f32 %v1915_v42, %v358_v60  ;;  %v1526_v54 = vld [vmem:[%s2518_s4 + $0xd0] sm:$0xff] }
 0x145   :  { %412 = vmatpush.msra.mxu1 %v1923_v48  ;;  %451 = vmatpush.msra.mxu2 %v1923_v48  ;;  %v1978_v21 = vmax.f32 %v375_v59, 0.0  ;;  %v373_v63 = vadd.f32 %v1915_v42, %v357_v62  ;;  %v372_v1 = vadd.f32 %v1915_v42, %v356_v0  ;;  %v371_v4 = vadd.f32 %v1915_v42, %v355_v2 }
 0x146   :  { %490 = vmatpush.msra.mxu3 %v1923_v48  ;;  %v1986_v20 = vmax.f32 %v374_v61, 0.0  ;;  %v370_v6 = vadd.f32 %v1915_v42, %v354_v5  ;;  %v1514_v42 = vld [vmem:[%s2518_s4 + $0xa0] sm:$0xff]  ;;  %s1664_s4 = smov 80  }
 0x147   :  { %413 = vmatpush.msra.mxu1 %v1930_v56  ;;  %452 = vmatpush.msra.mxu2 %v1930_v56  ;;  %v1994_v19 = vmax.f32 %v373_v63, 0.0  ;;  %v2002_v18 = vmax.f32 %v372_v1, 0.0  ;;  %v2008_v7 = vmax.f32 %v371_v4, 0.0 }
 0x148   :  { %491 = vmatpush.msra.mxu3 %v1930_v56  ;;  %v2013_v17 = vmax.f32 %v370_v6, 0.0  ;;  %v872_v6 = vld [vmem:[%s2519_s5 + $0x70] sm:$0xff] }
 0x149   :  { %414 = vmatpush.msra.mxu1 %v1938_v34  ;;  %453 = vmatpush.msra.mxu2 %v1938_v34 }
 0x14a   :  { %492 = vmatpush.msra.mxu3 %v1938_v34 }
 0x14b   :  { %415 = vmatpush.msra.mxu1 %v1946_v25  ;;  %454 = vmatpush.msra.mxu2 %v1946_v25 }
 0x14c   :  { %493 = vmatpush.msra.mxu3 %v1946_v25 }
 0x14d   :  { %416 = vmatpush.msra.mxu1 %v1954_v24  ;;  %455 = vmatpush.msra.mxu2 %v1954_v24 }
 0x14e   :  { %494 = vmatpush.msra.mxu3 %v1954_v24 }
 0x14f   :  { %417 = vmatpush.msra.mxu1 %v1962_v23  ;;  %456 = vmatpush.msra.mxu2 %v1962_v23 }
 0x150   :  { %495 = vmatpush.msra.mxu3 %v1962_v23 }
 0x151   :  { %418 = vmatpush.msra.mxu1 %v1970_v22  ;;  %457 = vmatpush.msra.mxu2 %v1970_v22 }
 0x152   :  { %496 = vmatpush.msra.mxu3 %v1970_v22 }
 0x153   :  { %419 = vmatpush.msra.mxu1 %v1978_v21  ;;  %458 = vmatpush.msra.mxu2 %v1978_v21 }
 0x154   :  { %497 = vmatpush.msra.mxu3 %v1978_v21 }
 0x155   :  { %420 = vmatpush.msra.mxu1 %v1986_v20  ;;  %459 = vmatpush.msra.mxu2 %v1986_v20 }
 0x156   :  { %498 = vmatpush.msra.mxu3 %v1986_v20 }
 0x157   :  { %421 = vmatpush.msra.mxu1 %v1994_v19  ;;  %460 = vmatpush.msra.mxu2 %v1994_v19 }
 0x158   :  { %499 = vmatpush.msra.mxu3 %v1994_v19 }
 0x159   :  { %422 = vmatpush.msra.mxu1 %v2002_v18  ;;  %461 = vmatpush.msra.mxu2 %v2002_v18 }
 0x15a   :  { %500 = vmatpush.msra.mxu3 %v2002_v18 }
 0x15b   :  { %423 = vmatpush.msra.mxu1 %v2008_v7  ;;  %462 = vmatpush.msra.mxu2 %v2008_v7 }
 0x15c   :  { %501 = vmatpush.msra.mxu3 %v2008_v7 }
 0x15d   :  { %424 = vmatpush.msra.mxu1 %v2013_v17  ;;  %463 = vmatpush.msra.mxu2 %v2013_v17 }
 0x15e   :  { %502 = vmatpush.msra.mxu3 %v2013_v17  ;;  %1485 = vmatmul.msk.f32.vlgmr.msra.gmra.mxu2 %vm399_vm7, %v1482_v8  ;;  %v869_v8 = vld [vmem:[%s2519_s5 + $0x58] sm:$0xff] }
 0x15f   :  { %529 = vmatpush.msrb.mxu1 %v1923_v48  ;;  %568 = vmatpush.msrb.mxu2 %v1923_v48 }
 0x160   :  { %607 = vmatpush.msrb.mxu3 %v1923_v48  ;;  %1479 = vmatmul.msk.f32.vlgmr.msra.gmra.mxu1 %vm399_vm7, %v396_v9  ;;  %v868_v9 = vld [vmem:[%s2519_s5 + $0x50] sm:$0xff] }
 0x161   :  { %530 = vmatpush.msrb.mxu1 %v1930_v56  ;;  %569 = vmatpush.msrb.mxu2 %v1930_v56 }
 0x162   :  { %608 = vmatpush.msrb.mxu3 %v1930_v56 }
 0x163   :  { %531 = vmatpush.msrb.mxu1 %v1938_v34  ;;  %570 = vmatpush.msrb.mxu2 %v1938_v34 }
 0x164   :  { %609 = vmatpush.msrb.mxu3 %v1938_v34 }
 0x165   :  { %532 = vmatpush.msrb.mxu1 %v1946_v25  ;;  %571 = vmatpush.msrb.mxu2 %v1946_v25 }
 0x166   :  { %610 = vmatpush.msrb.mxu3 %v1946_v25  ;;  %1486 = vmatmul.msk.f32.gmra.mxu2 %vm399_vm7, %v1483_v53  ;;  %v867_v53 = vld [vmem:[%s2519_s5 + $0x48] sm:$0xff] }
 0x167   :  { %1491 = vmatmul.msk.f32.vlgmr.msra.gmra.mxu3 %vm399_vm7, %v1488_v10  ;;  %533 = vmatpush.msrb.mxu1 %v1954_v24  ;;  %v866_v10 = vld [vmem:[%s2519_s5 + $0x40] sm:$0xff] }
 0x168   :  { %572 = vmatpush.msrb.mxu2 %v1954_v24  ;;  %611 = vmatpush.msrb.mxu3 %v1954_v24 }
 0x169   :  { %1480 = vmatmul.msk.f32.gmra.mxu1 %vm399_vm7, %v397_v11  ;;  %v865_v11 = vld [vmem:[%s2519_s5 + $0x38] sm:$0xff] }
 0x16a   :  { %534 = vmatpush.msrb.mxu1 %v1962_v23  ;;  %573 = vmatpush.msrb.mxu2 %v1962_v23 }
 0x16b   :  { %612 = vmatpush.msrb.mxu3 %v1962_v23 }
 0x16c   :  { %535 = vmatpush.msrb.mxu1 %v1970_v22  ;;  %574 = vmatpush.msrb.mxu2 %v1970_v22 }
 0x16d   :  { %613 = vmatpush.msrb.mxu3 %v1970_v22 }
 0x16e   :  { %536 = vmatpush.msrb.mxu1 %v1978_v21  ;;  %575 = vmatpush.msrb.mxu2 %v1978_v21 }
 0x16f   :  { %614 = vmatpush.msrb.mxu3 %v1978_v21  ;;  %1487 = vmatmul.msk.f32.gmra.mxu2 %vm399_vm7, %v1484_v12  ;;  %v864_v12 = vld [vmem:[%s2519_s5 + $0x30] sm:$0xff] }
 0x170   :  { %1492 = vmatmul.msk.f32.gmra.mxu3 %vm399_vm7, %v1489_v13  ;;  %537 = vmatpush.msrb.mxu1 %v1986_v20  ;;  %v863_v13 = vld [vmem:[%s2519_s5 + $0x28] sm:$0xff] }
 0x171   :  { %576 = vmatpush.msrb.mxu2 %v1986_v20  ;;  %615 = vmatpush.msrb.mxu3 %v1986_v20 }
 0x172   :  { %1481 = vmatmul.msk.f32.gmra.mxu1 %vm399_vm7, %v398_v14  ;;  %v875_v14 = vld [vmem:[%s2519_s5 + $0x88] sm:$0xff] }
 0x173   :  { %538 = vmatpush.msrb.mxu1 %v1994_v19  ;;  %577 = vmatpush.msrb.mxu2 %v1994_v19 }
 0x174   :  { %616 = vmatpush.msrb.mxu3 %v1994_v19 }
 0x175   :  { %539 = vmatpush.msrb.mxu1 %v2002_v18  ;;  %578 = vmatpush.msrb.mxu2 %v2002_v18 }
 0x176   :  { %617 = vmatpush.msrb.mxu3 %v2002_v18 }
 0x177   :  { %540 = vmatpush.msrb.mxu1 %v2008_v7  ;;  %579 = vmatpush.msrb.mxu2 %v2008_v7 }
 0x178   :  { %618 = vmatpush.msrb.mxu3 %v2008_v7 }
 0x179   :  { %541 = vmatpush.msrb.mxu1 %v2013_v17  ;;  %580 = vmatpush.msrb.mxu2 %v2013_v17 }
 0x17a   :  { %619 = vmatpush.msrb.mxu3 %v2013_v17  ;;  %1497 = vmatmul.msk.f32.vlgmr.msrb.gmra.mxu1 %vm399_vm7, %v1494_v15  ;;  %v874_v15 = vld [vmem:[%s2519_s5 + $0x80] sm:$0xff] }
 0x17b   :  { %1503 = vmatmul.msk.f32.vlgmr.msrb.gmra.mxu2 %vm399_vm7, %v1500_v16  ;;  %646 = vmatpush.msra.mxu1 %v1923_v48  ;;  %v862_v16 = vld [vmem:[%s2519_s5 + $0x20] sm:$0xff] }
 0x17c   :  { %685 = vmatpush.msra.mxu2 %v1923_v48  ;;  %1554 = vmatpush.msra.mxu3 %v1923_v48 }
 0x17d   :  { %647 = vmatpush.msra.mxu1 %v1930_v56  ;;  %1493 = vmatmul.msk.f32.gmra.mxu3 %vm399_vm7, %v1490_v27 }
 0x17e   :  { %686 = vmatpush.msra.mxu2 %v1930_v56  ;;  %1555 = vmatpush.msra.mxu3 %v1930_v56 }
 0x17f   :  { %648 = vmatpush.msra.mxu1 %v1938_v34 }
 0x180   :  { %687 = vmatpush.msra.mxu2 %v1938_v34  ;;  %1556 = vmatpush.msra.mxu3 %v1938_v34 }
 0x181   :  { %649 = vmatpush.msra.mxu1 %v1946_v25 }
 0x182   :  { %688 = vmatpush.msra.mxu2 %v1946_v25  ;;  %1557 = vmatpush.msra.mxu3 %v1946_v25 }
 0x183   :  { %1498 = vmatmul.msk.f32.gmra.mxu1 %vm399_vm7, %v1495_v28  ;;  %1504 = vmatmul.msk.f32.gmra.mxu2 %vm399_vm7, %v1501_v29  ;;  %v861_v28 = vld [vmem:[%s2519_s5 + $0x18] sm:$0xff]  ;;  %v860_v29 = vld [vmem:[%s2519_s5 + $0x10] sm:$0xff] }
 0x184   :  { %650 = vmatpush.msra.mxu1 %v1954_v24  ;;  %689 = vmatpush.msra.mxu2 %v1954_v24 }
 0x185   :  { %1558 = vmatpush.msra.mxu3 %v1954_v24 }
 0x186   :  { %651 = vmatpush.msra.mxu1 %v1962_v23  ;;  %690 = vmatpush.msra.mxu2 %v1962_v23 }
 0x187   :  { %1559 = vmatpush.msra.mxu3 %v1962_v23 }
 0x188   :  { %1509 = vmatmul.msk.f32.vlgmr.msrb.gmra.mxu3 %vm399_vm7, %v1506_v30  ;;  %652 = vmatpush.msra.mxu1 %v1970_v22  ;;  %v859_v30 = vld [vmem:[%s2519_s5 + $0x8] sm:$0xff] }
 0x189   :  { %691 = vmatpush.msra.mxu2 %v1970_v22  ;;  %1560 = vmatpush.msra.mxu3 %v1970_v22 }
 0x18a   :  { %653 = vmatpush.msra.mxu1 %v1978_v21 }
 0x18b   :  { %692 = vmatpush.msra.mxu2 %v1978_v21  ;;  %1561 = vmatpush.msra.mxu3 %v1978_v21 }
 0x18c   :  { %654 = vmatpush.msra.mxu1 %v1986_v20  ;;  %1505 = vmatmul.msk.f32.gmra.mxu2 %vm399_vm7, %v1502_v31  ;;  %v858_v31 = vld [vmem:[%s2519_s5] sm:$0xff] }
 0x18d   :  { %693 = vmatpush.msra.mxu2 %v1986_v20  ;;  %1562 = vmatpush.msra.mxu3 %v1986_v20 }
 0x18e   :  { %1499 = vmatmul.msk.f32.gmra.mxu1 %vm399_vm7, %v1496_v32 }
 0x18f   :  { %655 = vmatpush.msra.mxu1 %v1994_v19  ;;  %694 = vmatpush.msra.mxu2 %v1994_v19 }
 0x190   :  { %1563 = vmatpush.msra.mxu3 %v1994_v19 }
 0x191   :  { %1510 = vmatmul.msk.f32.gmra.mxu3 %vm399_vm7, %v1507_v33  ;;  %656 = vmatpush.msra.mxu1 %v2002_v18 }
 0x192   :  { %695 = vmatpush.msra.mxu2 %v2002_v18  ;;  %1564 = vmatpush.msra.mxu3 %v2002_v18 }
 0x193   :  { %657 = vmatpush.msra.mxu1 %v2008_v7 }
 0x194   :  { %696 = vmatpush.msra.mxu2 %v2008_v7  ;;  %1565 = vmatpush.msra.mxu3 %v2008_v7 }
 0x195   :  { %658 = vmatpush.msra.mxu1 %v2013_v17 }
 0x196   :  { %697 = vmatpush.msra.mxu2 %v2013_v17  ;;  %1566 = vmatpush.msra.mxu3 %v2013_v17 }
 0x197   :  { %1515 = vmatmul.msk.f32.vlgmr.msra.gmra.mxu1 %vm399_vm7, %v1512_v35  ;;  %1521 = vmatmul.msk.f32.vlgmr.msra.gmra.mxu2 %vm399_vm7, %v1518_v36 }
 0x198   :  { %724 = vmatpush.msrb.mxu2 %v1923_v48 }
 0x199   :  { %1511 = vmatmul.msk.f32.gmra.mxu3 %vm399_vm7, %v1508_v37 }
 0x19a   :  { %725 = vmatpush.msrb.mxu2 %v1930_v56 }
 0x19c   :  { %726 = vmatpush.msrb.mxu2 %v1938_v34 }
 0x19e   :  { %727 = vmatpush.msrb.mxu2 %v1946_v25 }
 0x19f   :  { %1516 = vmatmul.msk.f32.gmra.mxu1 %vm399_vm7, %v1513_v39  ;;  %1522 = vmatmul.msk.f32.gmra.mxu2 %vm399_vm7, %v1519_v40 }
 0x1a0   :  { %728 = vmatpush.msrb.mxu2 %v1954_v24 }
 0x1a1   :  { %1528 = vmatmul.msk.f32.vlgmr.msra.gmra.mxu3 %vm399_vm7, %v1525_v51 }
 0x1a2   :  { %729 = vmatpush.msrb.mxu2 %v1962_v23 }
 0x1a4   :  { %730 = vmatpush.msrb.mxu2 %v1970_v22 }
 0x1a6   :  { %731 = vmatpush.msrb.mxu2 %v1978_v21 }
 0x1a7   :  { %1523 = vmatmul.msk.f32.gmra.mxu2 %vm399_vm7, %v1520_v41  ;;  %1517 = vmatmul.msk.f32.gmra.mxu1 %vm399_vm7, %v1514_v42 }
 0x1a8   :  { %732 = vmatpush.msrb.mxu2 %v1986_v20 }
 0x1a9   :  { %1529 = vmatmul.msk.f32.gmra.mxu3 %vm399_vm7, %v1526_v54 }
 0x1aa   :  { %733 = vmatpush.msrb.mxu2 %v1994_v19 }
 0x1ac   :  { %734 = vmatpush.msrb.mxu2 %v2002_v18  ;;  %v873_v18 = vld [vmem:[%s2519_s5 + $0x78] sm:$0xff] }
 0x1ad   :  { %885 = vmatpush.msrb.mxu1 %v873_v18 }
 0x1ae   :  { %735 = vmatpush.msrb.mxu2 %v2008_v7  ;;  %v871_v7 = vld [vmem:[%s2519_s5 + $0x68] sm:$0xff] }
 0x1af   :  { %886 = vmatpush.msrb.mxu1 %v872_v6 }
 0x1b0   :  { %736 = vmatpush.msrb.mxu2 %v2013_v17  ;;  %v870_v17 = vld [vmem:[%s2519_s5 + $0x60] sm:$0xff] }
 0x1b1   :  { %1527 = vmatmul.msk.f32.vlgmr.msrb.gmra.mxu2 %vm399_vm7, %v1524_v49  ;;  %887 = vmatpush.msrb.mxu1 %v871_v7  ;;  %vm1446_vm7 = vcmask 25600  }
 0x1b2   :  { %925 = vmatpush.msra.mxu2 %v875_v14 }
 0x1b3   :  { %888 = vmatpush.msrb.mxu1 %v870_v17 }
 0x1b4   :  { %926 = vmatpush.msra.mxu2 %v874_v15  ;;  %v168_v15 = vadd.s32 16, %v1841_v38 }
 0x1b5   :  { %889 = vmatpush.msrb.mxu1 %v869_v8 }
 0x1b6   :  { %vm939_vm14 = vcmp.lt.s32.totalorder %v168_v15, 18 }
 0x1b7   :  { %890 = vmatpush.msrb.mxu1 %v868_v9 }
 0x1b9   :  { %891 = vmatpush.msrb.mxu1 %v867_v53 }
 0x1bb   :  { %892 = vmatpush.msrb.mxu1 %v866_v10 }
 0x1bd   :  { %893 = vmatpush.msrb.mxu1 %v865_v11 }
 0x1bf   :  { %894 = vmatpush.msrb.mxu1 %v864_v12 }
 0x1c1   :  { %895 = vmatpush.msrb.mxu1 %v863_v13 }
 0x1c3   :  { %896 = vmatpush.msrb.mxu1 %v862_v16 }
 0x1c5   :  { %897 = vmatpush.msrb.mxu1 %v861_v28 }
 0x1c7   :  { %898 = vmatpush.msrb.mxu1 %v860_v29 }
 0x1c9   :  { %899 = vmatpush.msrb.mxu1 %v859_v30  ;;  %v1533_v30 = vsel %vm939_vm14, 1.0, %v1659_v52 }
 0x1cb   :  { %900 = vmatpush.msrb.mxu1 %v858_v31 }
 0x1dd   :  { %v2206_v43 = vpop.f32.mrf.mxu1 }
 0x1e1   :  { %v465_v44 = vpop.f32.mrf.mxu2 }
 0x1e6   :  { %v2208_v46 = vpop.f32.mrf.mxu1 }
 0x1e9   :  { %v468_v47 = vpop.f32.mrf.mxu2 }
 0x1ea   :  { %v1576_v48 = vpack.i.bf16 %v468_v47, %v465_v44  ;;  %v504_v3 = vpop.f32.mrf.mxu3 }
 0x1ec   :  { %1577 = vrot.lane.b32.xlu0 %v1576_v48, %s1660_s24 }
 0x1ef   :  { %v2214_v56 = vpop.f32.mrf.mxu1 }
 0x1f2   :  { %v471_v34 = vpop.f32.mrf.mxu2 }
 0x1f3   :  { %v507_v45 = vpop.f32.mrf.mxu3 }
 0x1f4   :  { %v1581_v50 = vpack.i.bf16 %v507_v45, %v504_v3 }
 0x1f6   :  { %1582 = vrot.lane.b32.xlu0 %v1581_v50, %s1661_s25 }
 0x1f7   :  { %v543_v26 = vpop.f32.mrf.mxu1 }
 0x1fe   :  { %v582_v25 = vpop.f32.mrf.mxu2 }
 0x200   :  { %v546_v55 = vpop.f32.mrf.mxu1  ;;  %v510_v57 = vpop.f32.mrf.mxu3 }
 0x201   :  { %v1586_v24 = vpack.i.bf16 %v546_v55, %v543_v26 }
 0x203   :  { %1587 = vrot.lane.b32.xlu1 %v1586_v24, %s1662_s0 }
 0x206   :  { %v585_v58 = vpop.f32.mrf.mxu2 }
 0x207   :  { %v1591_v23 = vpack.i.bf16 %v585_v58, %v582_v25 }
 0x20b   :  { %v549_v59 = vpop.f32.mrf.mxu1  ;;  %v621_v60 = vpop.f32.mrf.mxu3  ;;  %1592 = vrot.lane.b32.xlu1 %v1591_v23, %s1663_s29 }
 0x20f   :  { %v588_v22 = vpop.f32.mrf.mxu2 }
 0x213   :  { %754 = vrot.lane.b32.xlu1 %v471_v34, %s1660_s24 }
 0x214   :  { %v624_v61 = vpop.f32.mrf.mxu3  ;;  %v660_v62 = vpop.f32.mrf.mxu1 }
 0x215   :  { %v1596_v21 = vpack.i.bf16 %v624_v61, %v621_v60 }
 0x217   :  { %1597 = vrot.lane.b32.xlu2 %v1596_v21, %s1664_s4 }
 0x21a   :  { %v699_v63 = vpop.f32.mrf.mxu2 }
 0x21b   :  { %790 = vrot.lane.b32.xlu1 %v588_v22, %s1663_s29 }
 0x21c   :  { %v663_v0 = vpop.f32.mrf.mxu1  ;;  %v627_v4 = vpop.f32.mrf.mxu3 }
 0x21d   :  { %v1601_v20 = vpack.i.bf16 %v663_v0, %v660_v62 }
 0x21f   :  { %1602 = vrot.lane.b32.xlu2 %v1601_v20, %s1665_s30 }
 0x222   :  { %v702_v1 = vpop.f32.mrf.mxu2 }
 0x223   :  { %v1606_v2 = vpack.i.bf16 %v702_v1, %v699_v63 }
 0x224   :  { %v666_v5 = vpop.f32.mrf.mxu1  ;;  %v741_v32 = vpop.f32.mrf.mxu3 }
 0x225   :  { %1607 = vrot.lane.b32.xlu0 %v1606_v2, %s1666_s15 }
 0x227   :  { %766 = vrot.lane.b32.xlu2 %v510_v57, %s1661_s25 }
 0x22a   :  { %v705_v19 = vpop.f32.mrf.mxu2 }
 0x22b   :  { %826 = vrot.lane.b32.xlu1 %v705_v19, %s1666_s15 }
 0x22c   :  { %v744_v36 = vpop.f32.mrf.mxu3 }
 0x22d   :  { %778 = vrot.lane.b32.xlu0 %v549_v59, %s1662_s0 }
 0x22f   :  { %802 = vrot.lane.b32.xlu2 %v627_v4, %s1664_s4 }
 0x234   :  { %v738_v27 = vpop.f32.mrf.mxu2 }
 0x235   :  { %814 = vrot.lane.b32.xlu0 %v666_v5, %s1665_s30  ;;  %1530 = vmatmul.msk.f32.vlgmr.msra.gmra.mxu2 %vm231_vm2, %v738_v27 }
 0x23d   :  { %1531 = vmatmul.msk.f32.gmra.mxu2 %vm231_vm2, %v741_v32 }
 0x245   :  { %1532 = vmatmul.msk.f32.gmra.mxu2 %vm231_vm2, %v744_v36 }
 0x25e   :  { %v1578_v33 = vpop.permute.xlu0 %1577 }
 0x25f   :  { %v1579_v41 = vunpack.i.l.bf16 %v1578_v33  ;;  %v1580_v26 = vunpack.i.h.bf16 %v1578_v33 }
 0x261   :  { %v831_v48 = vsel %vm231_vm2, %v2206_v43, %v1579_v41  ;;  %v832_v58 = vsel %vm231_vm2, %v2208_v46, %v1580_v26 }
 0x268   :  { %v1583_v39 = vpop.permute.xlu0 %1582 }
 0x269   :  { %v1584_v42 = vunpack.i.l.bf16 %v1583_v39  ;;  %v1585_v25 = vunpack.i.h.bf16 %v1583_v39 }
 0x26b   :  { %v835_v3 = vsel %vm834_vm8, %v831_v48, %v1584_v42  ;;  %v836_v59 = vsel %vm834_vm8, %v832_v58, %v1585_v25 }
 0x271   :  { %v1598_v37 = vpop.permute.xlu2 %1597 }
 0x272   :  { %v1599_v49 = vunpack.i.l.bf16 %v1598_v37  ;;  %v1600_v22 = vunpack.i.h.bf16 %v1598_v37 }
 0x275   :  { %v1588_v35 = vpop.permute.xlu1 %1587 }
 0x276   :  { %v1589_v44 = vunpack.i.l.bf16 %v1588_v35  ;;  %v1590_v55 = vunpack.i.h.bf16 %v1588_v35 }
 0x278   :  { %v839_v45 = vsel %vm838_vm9, %v835_v3, %v1589_v44  ;;  %v840_v61 = vsel %vm838_vm9, %v836_v59, %v1590_v55 }
 0x279   :  { %v1603_v50 = vpop.permute.xlu2 %1602 }
 0x27a   :  { %v1604_v54 = vunpack.i.l.bf16 %v1603_v50  ;;  %v1605_v0 = vunpack.i.h.bf16 %v1603_v50 }
 0x27d   :  { %v1593_v40 = vpop.permute.xlu1 %1592 }
 0x27e   :  { %v1594_v47 = vunpack.i.l.bf16 %v1593_v40  ;;  %v1595_v57 = vunpack.i.h.bf16 %v1593_v40 }
 0x280   :  { %v843_v34 = vsel %vm842_vm10, %v839_v45, %v1594_v47  ;;  %v844_v21 = vsel %vm842_vm10, %v840_v61, %v1595_v57 }
 0x281   :  { %v847_v24 = vsel %vm846_vm11, %v843_v34, %v1599_v49  ;;  %v767_v63 = vpop.permute.xlu2 %766  ;;  %v848_v2 = vsel %vm846_vm11, %v844_v21, %v1600_v22 }
 0x282   :  { %v851_v60 = vsel %vm850_vm12, %v847_v24, %v1604_v54  ;;  %v852_v18 = vsel %vm850_vm12, %v848_v2, %v1605_v0  ;;  %v982_v2 = vld [vmem:[%s2520_s6] sm:$0x1] }
 0x285   :  { %v755_v51 = vpop.permute.xlu1 %754 }
 0x286   :  { %v833_v20 = vsel %vm231_vm2, %v2214_v56, %v755_v51  ;;  %vm1014_vm2 = vcmask 195584  }
 0x287   :  { %v837_v4 = vsel %vm834_vm8, %v833_v20, %v767_v63 }
 0x289   :  { %v803_v17 = vpop.permute.xlu2 %802 }
 0x28d   :  { %v791_v1 = vpop.permute.xlu1 %790 }
 0x297   :  { %v1608_v43 = vpop.permute.xlu0 %1607 }
 0x298   :  { %v1609_v23 = vunpack.i.l.bf16 %v1608_v43  ;;  %v1610_v46 = vunpack.i.h.bf16 %v1608_v43 }
 0x29a   :  { %v855_v62 = vsel %vm854_vm13, %v851_v60, %v1609_v23  ;;  %v856_v6 = vsel %vm854_vm13, %v852_v18, %v1610_v46  ;;  %v995_v18 = vld [vmem:[%s2521_s7] sm:$0x1] }
 0x29b   :  { %901 = vmatmul.f32.vlgmr.msrb.gmra.mxu1 %v855_v62 }
 0x29d   :  { %v827_v8 = vpop.permute.xlu1 %826 }
 0x29f   :  { %v779_v19 = vpop.permute.xlu0 %778 }
 0x2a0   :  { %v841_v5 = vsel %vm838_vm9, %v837_v4, %v779_v19 }
 0x2a1   :  { %v845_v7 = vsel %vm842_vm10, %v841_v5, %v791_v1 }
 0x2a2   :  { %v849_v56 = vsel %vm846_vm11, %v845_v7, %v803_v17 }
 0x2a3   :  { %904 = vmatmul.f32.gmra.mxu1 %v856_v6 }
 0x2a7   :  { %v815_v9 = vpop.permute.xlu0 %814 }
 0x2a8   :  { %v853_v53 = vsel %vm850_vm12, %v849_v56, %v815_v9 }
 0x2a9   :  { %v857_v10 = vsel %vm854_vm13, %v853_v53, %v827_v8 }
 0x2ab   :  { %907 = vmatmul.f32.gmra.mxu1 %v857_v10 }
 0x2b8   :  { %v928_v11 = vpop.f32.mrf.mxu2 }
 0x2c0   :  { %v931_v13 = vpop.f32.mrf.mxu2 }
 0x2c8   :  { %v934_v27 = vpop.f32.mrf.mxu2 }
 0x318   :  { %v902_v12 = vpop.f32.mrf.mxu1 }
 0x319   :  { %v929_v28 = vadd.f32 %v928_v11, %v902_v12 }
 0x31b   :  { %v949_v33 = vsel %vm834_vm8, %v929_v28, 0.0 }
 0x320   :  { %v905_v14 = vpop.f32.mrf.mxu1 }
 0x321   :  { %v932_v16 = vadd.f32 %v931_v13, %v905_v14 }
 0x323   :  { %v950_v31 = vsel %vm834_vm8, %v932_v16, 0.0 }
 0x324   :  { %v951_v36 = vadd.f32 %v950_v31, %v949_v33  ;;  %v1543_v31 = vld [vmem:[%s2522_s8 + $0x28] sm:$0xff]  ;;  %v1547_v33 = vld [vmem:[%s2522_s8 + $0x38] sm:$0xff] }
 0x328   :  { %v908_v29 = vpop.f32.mrf.mxu1 }
 0x329   :  { %v935_v32 = vadd.f32 %v934_v27, %v908_v29  ;;  %v1013_v27 = vld [vmem:[%s2522_s8] sm:$0xff] }
 0x32a   :  { %v1541_v29 = vld [vmem:[%s2522_s8 + $0x20] sm:$0xff] }
 0x32b   :  { %v948_v35 = vmul.f32 %v1533_v30, %v935_v32 }
 0x32d   :  { %v952_v37 = vsel %vm834_vm8, %v948_v35, 0.0 }
 0x32e   :  { %v953_v39 = vadd.f32 %v952_v37, %v951_v36  ;;  %v1549_v36 = vld [vmem:[%s2522_s8 + $0x40] sm:$0xff] }
 0x330   :  { %v954_v40 = vrot.slane %v953_v39, 4 }
 0x332   :  { %v955_v41 = vadd.f32 %v954_v40, %v953_v39 }
 0x334   :  { %v956_v42 = vrot.slane %v955_v41, 2 }
 0x336   :  { %v957_v44 = vadd.f32 %v956_v42, %v955_v41 }
 0x338   :  { %v958_v47 = vrot.slane %v957_v44, 1 }
 0x33a   :  { %v959_v48 = vadd.f32 %v958_v47, %v957_v44 }
 0x33c   :  { %v960_v3 = vmul.f32 0.055555556, %v959_v48 }
 0x33e   :  { %v961_v49 = vsub.f32 %v929_v28, %v960_v3  ;;  %v962_v45 = vsub.f32 %v932_v16, %v960_v3  ;;  %v963_v50 = vsub.f32 %v935_v32, %v960_v3 }
 0x340   :  { %v966_v34 = vmul.f32 %v1533_v30, %v963_v50  ;;  %v967_v26 = vmul.f32 %v961_v49, %v961_v49  ;;  %v968_v51 = vmul.f32 %v962_v45, %v962_v45  ;;  %v1539_v30 = vld [vmem:[%s2522_s8 + $0x18] sm:$0xff] }
 0x341   :  { %v1283_v45 = vld [vmem:[%s2523_s9 + $0x78] sm:$0xff] }
 0x342   :  { %v969_v25 = vmul.f32 %v966_v34, %v966_v34  ;;  %v970_v54 = vsel %vm834_vm8, %v967_v26, 0.0  ;;  %v971_v55 = vsel %vm834_vm8, %v968_v51, 0.0  ;;  %v1299_v50 = vld [vmem:[%s2523_s9 + $0xf8] sm:$0xff]  ;;  %v1282_v34 = vld [vmem:[%s2523_s9 + $0x70] sm:$0xff]  ;;  %1307 = vmatpush.msrb.mxu2 %v1283_v45  ;;  %v1281_v51 = vld [vmem:[%s2523_s9 + $0x68] sm:$0xff] }
 0x343   :  { %v972_v24 = vadd.f32 %v971_v55, %v970_v54  ;;  %v1298_v26 = vld [vmem:[%s2523_s9 + $0xf0] sm:$0xff]  ;;  %v1280_v54 = vld [vmem:[%s2523_s9 + $0x60] sm:$0xff] }
 0x344   :  { %v973_v57 = vsel %vm834_vm8, %v969_v25, 0.0  ;;  %v1297_v25 = vld [vmem:[%s2523_s9 + $0xe8] sm:$0xff]  ;;  %1308 = vmatpush.msrb.mxu2 %v1282_v34  ;;  %v1296_v55 = vld [vmem:[%s2523_s9 + $0xe0] sm:$0xff] }
 0x345   :  { %v974_v43 = vadd.f32 %v973_v57, %v972_v24  ;;  %v1279_v24 = vld [vmem:[%s2523_s9 + $0x58] sm:$0xff] }
 0x346   :  { %1309 = vmatpush.msrb.mxu2 %v1281_v51  ;;  %v1295_v57 = vld [vmem:[%s2523_s9 + $0xd8] sm:$0xff] }
 0x347   :  { %v975_v58 = vrot.slane %v974_v43, 4 }
 0x348   :  { %1310 = vmatpush.msrb.mxu2 %v1280_v54 }
 0x349   :  { %v976_v23 = vadd.f32 %v975_v58, %v974_v43  ;;  %v1278_v43 = vld [vmem:[%s2523_s9 + $0x50] sm:$0xff] }
 0x34a   :  { %v1294_v58 = vld [vmem:[%s2523_s9 + $0xd0] sm:$0xff]  ;;  %1311 = vmatpush.msrb.mxu2 %v1279_v24 }
 0x34b   :  { %v977_v59 = vrot.slane %v976_v23, 2 }
 0x34c   :  { %1312 = vmatpush.msrb.mxu2 %v1278_v43 }
 0x34d   :  { %v978_v60 = vadd.f32 %v977_v59, %v976_v23  ;;  %v1277_v23 = vld [vmem:[%s2523_s9 + $0x48] sm:$0xff] }
 0x34e   :  { %v1293_v59 = vld [vmem:[%s2523_s9 + $0xc8] sm:$0xff]  ;;  %1313 = vmatpush.msrb.mxu2 %v1277_v23 }
 0x34f   :  { %v979_v22 = vrot.slane %v978_v60, 1 }
 0x351   :  { %v980_v61 = vadd.f32 %v979_v22, %v978_v60  ;;  %v1276_v60 = vld [vmem:[%s2523_s9 + $0x40] sm:$0xff] }
 0x352   :  { %v1292_v22 = vld [vmem:[%s2523_s9 + $0xc0] sm:$0xff]  ;;  %1314 = vmatpush.msrb.mxu2 %v1276_v60 }
 0x353   :  { %v981_v62 = vmul.f32 0.055555556, %v980_v61  ;;  %v1275_v61 = vld [vmem:[%s2523_s9 + $0x38] sm:$0xff] }
 0x354   :  { %1315 = vmatpush.msrb.mxu2 %v1275_v61 }
 0x355   :  { %v983_v21 = vadd.f32 1e-05, %v981_v62  ;;  %v1291_v62 = vld [vmem:[%s2523_s9 + $0xb8] sm:$0xff] }
 0x357   :  { %1629 = vrsqrt.f32 %v983_v21  ;;  %vm990_vm0 = vweird.f32 %v983_v21 }
 0x35d   :  { %v1630_v63 = vpop.eup %1629 }
 0x35e   :  { %v985_v0 = vmul.f32 %v1630_v63, %v983_v21  ;;  %vm991_vm15 = vweird.f32 %v1630_v63  ;;  %v1274_v21 = vld [vmem:[%s2523_s9 + $0x30] sm:$0xff] }
 0x35f   :  { %vm992_vm1 = vmor %vm990_vm0, %vm991_vm15  ;;  %1316 = vmatpush.msrb.mxu2 %v1274_v21 }
 0x360   :  { %v986_v20 = vmul.f32 %v1630_v63, %v985_v0  ;;  %v1273_v0 = vld [vmem:[%s2523_s9 + $0x28] sm:$0xff] }
 0x361   :  { %1317 = vmatpush.msrb.mxu2 %v1273_v0 }
 0x362   :  { %v987_v1 = vmul.f32 0.5, %v986_v20  ;;  %v1289_v20 = vld [vmem:[%s2523_s9 + $0xa8] sm:$0xff] }
 0x364   :  { %v988_v46 = vsub.f32 1.5, %v987_v1  ;;  %v1272_v1 = vld [vmem:[%s2523_s9 + $0x20] sm:$0xff] }
 0x365   :  { %1318 = vmatpush.msrb.mxu2 %v1272_v1 }
 0x366   :  { %v989_v19 = vmul.f32 %v1630_v63, %v988_v46  ;;  %v1288_v46 = vld [vmem:[%s2523_s9 + $0xa0] sm:$0xff] }
 0x368   :  { %v993_v4 = vsel %vm992_vm1, %v1630_v63, %v989_v19  ;;  %v1290_v63 = vld [vmem:[%s2523_s9 + $0xb0] sm:$0xff]  ;;  %v1287_v19 = vld [vmem:[%s2523_s9 + $0x98] sm:$0xff] }
 0x369   :  { %v994_v5 = vmul.f32 %v993_v4, %v982_v2  ;;  %v1271_v2 = vld [vmem:[%s2523_s9 + $0x18] sm:$0xff]  ;;  %v1270_v4 = vld [vmem:[%s2523_s9 + $0x10] sm:$0xff] }
 0x36a   :  { %1319 = vmatpush.msrb.mxu2 %v1271_v2  ;;  %v1390_v2 = vld [vmem:[%s2524_s10] sm:$0x1] }
 0x36b   :  { %v996_v6 = vmul.f32 %v994_v5, %v960_v3  ;;  %v999_v7 = vperm.slane %v994_v5, 0  ;;  %v1286_v5 = vld [vmem:[%s2523_s9 + $0x90] sm:$0xff] }
 0x36c   :  { %1320 = vmatpush.msrb.mxu2 %v1270_v4 }
 0x36d   :  { %v997_v17 = vsub.f32 %v995_v18, %v996_v6  ;;  %v1002_v8 = vmul.f32 %v999_v7, %v932_v16  ;;  %v1003_v56 = vmul.f32 %v999_v7, %v935_v32  ;;  %v1001_v53 = vmul.f32 %v999_v7, %v929_v28  ;;  %v1537_v16 = vld [vmem:[%s2522_s8 + $0x10] sm:$0xff]  ;;  %v1535_v28 = vld [vmem:[%s2522_s8 + $0x8] sm:$0xff]  ;;  %v1268_v7 = vld [vmem:[%s2523_s9] sm:$0xff] }
 0x36e   :  { %v1545_v32 = vld [vmem:[%s2522_s8 + $0x30] sm:$0xff]  ;;  %v1269_v18 = vld [vmem:[%s2523_s9 + $0x8] sm:$0xff] }
 0x36f   :  { %v1005_v9 = vperm.slane %v997_v17, 0  ;;  %v1285_v6 = vld [vmem:[%s2523_s9 + $0x88] sm:$0xff]  ;;  %1321 = vmatpush.msrb.mxu2 %v1269_v18  ;;  %v1284_v17 = vld [vmem:[%s2523_s9 + $0x80] sm:$0xff] }
 0x370   :  { %v1403_v18 = vld [vmem:[%s2525_s11] sm:$0x1] }
 0x371   :  { %v1008_v10 = vadd.f32 %v1005_v9, %v1002_v8  ;;  %v1009_v11 = vadd.f32 %v1005_v9, %v1003_v56  ;;  %v1007_v12 = vadd.f32 %v1005_v9, %v1001_v53  ;;  %1322 = vmatpush.msrb.mxu2 %v1268_v7  ;;  %v1303_v8 = vld [vmem:[%s2523_s9 + $0x118] sm:$0xff]  ;;  %v1302_v56 = vld [vmem:[%s2523_s9 + $0x110] sm:$0xff]  ;;  %v1301_v9 = vld [vmem:[%s2523_s9 + $0x108] sm:$0xff] }
 0x372   :  { %v1300_v53 = vld [vmem:[%s2523_s9 + $0x100] sm:$0xff] }
 0x373   :  { %v1012_v13 = vmax.f32 %v1009_v11, 0.0  ;;  %v1011_v14 = vmax.f32 %v1008_v10, 0.0  ;;  %v1010_v15 = vmax.f32 %v1007_v12, 0.0 }
 0x375   :  { %1031 = vmatpush.msrb.mxu3 %v1012_v13  ;;  %1081 = vmatpush.msrb.mxu0 %v1012_v13 }
 0x376   :  { %1231 = vmatpush.msra.mxu1 %v1012_v13 }
 0x377   :  { %1032 = vmatpush.msrb.mxu3 %v1011_v14  ;;  %1082 = vmatpush.msrb.mxu0 %v1011_v14 }
 0x378   :  { %1232 = vmatpush.msra.mxu1 %v1011_v14 }
 0x379   :  { %1033 = vmatpush.msrb.mxu3 %v1010_v15  ;;  %1083 = vmatpush.msrb.mxu0 %v1010_v15 }
 0x37a   :  { %1233 = vmatpush.msra.mxu1 %v1010_v15  ;;  %1534 = vmatmul.msk.f32.vlgmr.msrb.gmra.mxu3 %vm1014_vm2, %v1013_v27 }
 0x37b   :  { %1056 = vmatpush.msra.mxu3 %v1012_v13  ;;  %1538 = vmatmul.msk.f32.vlgmr.msrb.gmra.mxu0 %vm1014_vm2, %v1537_v16 }
 0x37c   :  { %1131 = vmatpush.msra.mxu0 %v1012_v13  ;;  %1550 = vmatmul.msk.f32.vlgmr.msra.gmra.mxu1 %vm1014_vm2, %v1549_v36 }
 0x37d   :  { %1057 = vmatpush.msra.mxu3 %v1011_v14 }
 0x37e   :  { %1132 = vmatpush.msra.mxu0 %v1011_v14 }
 0x37f   :  { %1058 = vmatpush.msra.mxu3 %v1010_v15 }
 0x380   :  { %1133 = vmatpush.msra.mxu0 %v1010_v15 }
 0x381   :  { %1106 = vmatpush.msrb.mxu3 %v1012_v13 }
 0x382   :  { %1156 = vmatpush.msrb.mxu0 %v1012_v13  ;;  %1536 = vmatmul.msk.f32.vlgmr.msra.gmra.mxu3 %vm1014_vm2, %v1535_v28 }
 0x383   :  { %1107 = vmatpush.msrb.mxu3 %v1011_v14  ;;  %1542 = vmatmul.msk.f32.vlgmr.msra.gmra.mxu0 %vm1014_vm2, %v1541_v29 }
 0x384   :  { %1157 = vmatpush.msrb.mxu0 %v1011_v14 }
 0x385   :  { %1108 = vmatpush.msrb.mxu3 %v1010_v15 }
 0x386   :  { %1158 = vmatpush.msrb.mxu0 %v1010_v15 }
 0x387   :  { %1181 = vmatpush.msra.mxu3 %v1012_v13 }
 0x388   :  { %1206 = vmatpush.msra.mxu0 %v1012_v13 }
 0x389   :  { %1182 = vmatpush.msra.mxu3 %v1011_v14 }
 0x38a   :  { %1207 = vmatpush.msra.mxu0 %v1011_v14  ;;  %1540 = vmatmul.msk.f32.vlgmr.msrb.gmra.mxu3 %vm1014_vm2, %v1539_v30 }
 0x38b   :  { %1183 = vmatpush.msra.mxu3 %v1010_v15  ;;  %1544 = vmatmul.msk.f32.vlgmr.msrb.gmra.mxu0 %vm1014_vm2, %v1543_v31 }
 0x38c   :  { %1208 = vmatpush.msra.mxu0 %v1010_v15 }
 0x38d   :  { %1327 = vmatpush.msrb.mxu3 %v1299_v50 }
 0x38e   :  { %1359 = vmatpush.msrb.mxu0 %v1303_v8 }
 0x38f   :  { %1328 = vmatpush.msrb.mxu3 %v1298_v26 }
 0x390   :  { %1360 = vmatpush.msrb.mxu0 %v1302_v56 }
 0x391   :  { %1329 = vmatpush.msrb.mxu3 %v1297_v25 }
 0x392   :  { %1546 = vmatmul.msk.f32.vlgmr.msra.gmra.mxu3 %vm1014_vm2, %v1545_v32  ;;  %1361 = vmatpush.msrb.mxu0 %v1301_v9 }
 0x393   :  { %1548 = vmatmul.msk.f32.vlgmr.msra.gmra.mxu0 %vm1014_vm2, %v1547_v33  ;;  %1330 = vmatpush.msrb.mxu3 %v1296_v55 }
 0x394   :  { %1362 = vmatpush.msrb.mxu0 %v1300_v53 }
 0x395   :  { %1331 = vmatpush.msrb.mxu3 %v1295_v57 }
 0x397   :  { %1332 = vmatpush.msrb.mxu3 %v1294_v58  ;;  %v1418_v58 = vld [vmem:[%s2526_s12 + $0x18] sm:$0xff] }
 0x398   :  { %1438 = vmatpush.msrb.mxu1 %v1418_v58 }
 0x399   :  { %1333 = vmatpush.msrb.mxu3 %v1293_v59  ;;  %v1417_v59 = vld [vmem:[%s2526_s12 + $0x10] sm:$0xff] }
 0x39a   :  { %1439 = vmatpush.msrb.mxu1 %v1417_v59 }
 0x39b   :  { %1334 = vmatpush.msrb.mxu3 %v1292_v22  ;;  %v1416_v22 = vld [vmem:[%s2526_s12 + $0x8] sm:$0xff] }
 0x39c   :  { %1440 = vmatpush.msrb.mxu1 %v1416_v22 }
 0x39d   :  { %1335 = vmatpush.msrb.mxu3 %v1291_v62  ;;  %v1415_v62 = vld [vmem:[%s2526_s12] sm:$0xff] }
 0x39e   :  { %1441 = vmatpush.msrb.mxu1 %v1415_v62 }
 0x39f   :  { %1336 = vmatpush.msrb.mxu3 %v1290_v63 }
 0x3a1   :  { %1337 = vmatpush.msrb.mxu3 %v1289_v20 }
 0x3a3   :  { %1338 = vmatpush.msrb.mxu3 %v1288_v46 }
 0x3a5   :  { %1339 = vmatpush.msrb.mxu3 %v1287_v19 }
 0x3a7   :  { %1340 = vmatpush.msrb.mxu3 %v1286_v5 }
 0x3a9   :  { %1341 = vmatpush.msrb.mxu3 %v1285_v6 }
 0x3ab   :  { %1342 = vmatpush.msrb.mxu3 %v1284_v17 }
 0x3f8   :  { %v1085_v35 = vpop.f32.mrf.mxu0 }
 0x3f9   :  { %v1235_v10 = vpop.f32.mrf.mxu1 }
 0x3fa   :  { %1551 = vmatmul.msk.f32.vlgmr.msrb.gmra.mxu0 %vm834_vm8, %v1235_v10  ;;  %v1626_v10 = vld [vmem:[%s2527_s13] ss:$0 sm:$0xff] }
 0x3fd   :  { %v2361_v37 = vpop.f32.mrf.mxu3 }
 0x400   :  { %v2363_v39 = vpop.f32.mrf.mxu0 }
 0x405   :  { %v1060_v40 = vpop.f32.mrf.mxu3 }
 0x408   :  { %v1160_v41 = vpop.f32.mrf.mxu0 }
 0x409   :  { %v1611_v42 = vpack.i.bf16 %v1160_v41, %v1060_v40 }
 0x40b   :  { %1612 = vrot.lane.b32.xlu2 %v1611_v42, %s1661_s25 }
 0x40d   :  { %v1110_v44 = vpop.f32.mrf.mxu3 }
 0x410   :  { %v1210_v47 = vpop.f32.mrf.mxu0 }
 0x411   :  { %v1621_v48 = vpack.i.bf16 %v1210_v47, %v1110_v44 }
 0x413   :  { %1622 = vrot.lane.b32.xlu1 %v1621_v48, %s1665_s30 }
 0x415   :  { %v1185_v3 = vpop.f32.mrf.mxu3 }
 0x416   :  { %v1616_v49 = vpack.i.bf16 %v1185_v3, %v1085_v35 }
 0x418   :  { %1617 = vrot.lane.b32.xlu0 %v1616_v49, %s1663_s29  ;;  %s1453_s29 = sshll.u32 %s1667_s17, 4  ;;  %s1454_s29 = int_to_ptr.vmem [resolvable:$true] %s1453_s29 }
 0x465   :  { %v1613_v11 = vpop.permute.xlu2 %1612 }
 0x466   :  { %v1615_v12 = vunpack.i.h.bf16 %v1613_v11  ;;  %v1614_v13 = vunpack.i.l.bf16 %v1613_v11 }
 0x468   :  { %v1265_v28 = vsel %vm834_vm8, %v2363_v39, %v1615_v12  ;;  %v1262_v29 = vsel %vm834_vm8, %v2361_v37, %v1614_v13  ;;  %v1552_v37 = vsel %vm1367_vm3, 1.0, %v1659_v52 }
 0x477   :  { %v1364_v40 = vpop.f32.mrf.mxu0 }
 0x485   :  { %v1623_v14 = vpop.permute.xlu1 %1622 }
 0x486   :  { %v1625_v30 = vunpack.i.h.bf16 %v1623_v14  ;;  %v1624_v31 = vunpack.i.l.bf16 %v1623_v14 }
 0x48a   :  { %v1618_v15 = vpop.permute.xlu0 %1617 }
 0x48b   :  { %v1620_v27 = vunpack.i.h.bf16 %v1618_v15  ;;  %v1619_v16 = vunpack.i.l.bf16 %v1618_v15 }
 0x48d   :  { %v1266_v32 = vsel %vm842_vm10, %v1265_v28, %v1620_v27  ;;  %v1263_v33 = vsel %vm842_vm10, %v1262_v29, %v1619_v16 }
 0x48e   :  { %v1264_v35 = vsel %vm850_vm12, %v1263_v33, %v1624_v31  ;;  %v1267_v36 = vsel %vm850_vm12, %v1266_v32, %v1625_v30 }
 0x48f   :  { %1323 = vmatmul.f32.vlgmr.msrb.gmra.mxu2 %v1264_v35  ;;  %1343 = vmatmul.f32.vlgmr.msrb.gmra.mxu3 %v1267_v36 }
 0x512   :  { %v1324_v41 = vpop.f32.mrf.mxu2  ;;  %v1344_v39 = vpop.f32.mrf.mxu3 }
 0x513   :  { %v1345_v42 = vadd.f32 %v1344_v39, %v1324_v41 }
 0x515   :  { %v1365_v44 = vadd.f32 %v1364_v40, %v1345_v42 }
 0x517   :  { %v1370_v47 = vmul.f32 %v1552_v37, %v1365_v44 }
 0x519   :  { %v1371_v48 = vsel %vm834_vm8, %v1370_v47, 0.0 }
 0x51a   :  { %v1372_v3 = vrot.slane %v1371_v48, 4 }
 0x51c   :  { %v1373_v49 = vadd.f32 %v1372_v3, %v1371_v48 }
 0x51e   :  { %v1374_v45 = vrot.slane %v1373_v49, 2 }
 0x520   :  { %v1375_v50 = vadd.f32 %v1374_v45, %v1373_v49 }
 0x522   :  { %v1376_v34 = vrot.slane %v1375_v50, 1 }
 0x524   :  { %v1377_v26 = vadd.f32 %v1376_v34, %v1375_v50 }
 0x526   :  { %v1378_v51 = vmul.f32 0.5, %v1377_v26 }
 0x528   :  { %v1379_v25 = vsub.f32 %v1365_v44, %v1378_v51 }
 0x52a   :  { %v1380_v54 = vmul.f32 %v1552_v37, %v1379_v25 }
 0x52c   :  { %v1381_v55 = vmul.f32 %v1380_v54, %v1380_v54 }
 0x52e   :  { %v1382_v38 = vsel %vm834_vm8, %v1381_v55, 0.0 }
 0x52f   :  { %v1383_v24 = vrot.slane %v1382_v38, 4 }
 0x531   :  { %v1384_v57 = vadd.f32 %v1383_v24, %v1382_v38 }
 0x533   :  { %v1385_v43 = vrot.slane %v1384_v57, 2 }
 0x535   :  { %v1386_v52 = vadd.f32 %v1385_v43, %v1384_v57 }
 0x537   :  { %v1387_v23 = vrot.slane %v1386_v52, 1 }
 0x539   :  { %v1388_v60 = vadd.f32 %v1387_v23, %v1386_v52 }
 0x53b   :  { %v1389_v61 = vmul.f32 0.5, %v1388_v60 }
 0x53d   :  { %v1391_v21 = vadd.f32 1e-05, %v1389_v61 }
 0x53f   :  { %1631 = vrsqrt.f32 %v1391_v21  ;;  %vm1398_vm5 = vweird.f32 %v1391_v21 }
 0x545   :  { %v1632_v63 = vpop.eup %1631 }
 0x546   :  { %v1393_v0 = vmul.f32 %v1632_v63, %v1391_v21  ;;  %vm1399_vm4 = vweird.f32 %v1632_v63 }
 0x547   :  { %vm1400_vm6 = vmor %vm1398_vm5, %vm1399_vm4 }
 0x548   :  { %v1394_v20 = vmul.f32 %v1632_v63, %v1393_v0 }
 0x54a   :  { %v1395_v1 = vmul.f32 0.5, %v1394_v20 }
 0x54c   :  { %v1396_v46 = vsub.f32 1.5, %v1395_v1 }
 0x54e   :  { %v1397_v19 = vmul.f32 %v1632_v63, %v1396_v46 }
 0x550   :  { %v1401_v4 = vsel %vm1400_vm6, %v1632_v63, %v1397_v19 }
 0x551   :  { %v1402_v5 = vmul.f32 %v1401_v4, %v1390_v2 }
 0x553   :  { %v1404_v6 = vmul.f32 %v1402_v5, %v1378_v51  ;;  %v1407_v7 = vperm.slane %v1402_v5, 0 }
 0x555   :  { %v1405_v17 = vsub.f32 %v1403_v18, %v1404_v6  ;;  %v1409_v8 = vmul.f32 %v1407_v7, %v1365_v44 }
 0x557   :  { %v1411_v56 = vperm.slane %v1405_v17, 0 }
 0x559   :  { %v1413_v9 = vadd.f32 %v1411_v56, %v1409_v8 }
 0x55b   :  { %v1414_v53 = vmax.f32 %v1413_v9, 0.0 }
 0x55d   :  { %1553 = vmatmul.msk.f32.vlgmr.msrb.gmra.mxu1 %vm834_vm8, %v1414_v53 }
 0x5da   :  { %v1443_v11 = vpop.f32.mrf.mxu1 }
 0x5db   :  { %v1444_v12 = vadd.f32 %v1626_v10, %v1443_v11 }
 0x5dd   :  { %1447 = vst.msk [vmem:[#allocation2] sm:$0x3] %vm1446_vm7, %v1444_v12 }
 0x5de   :  { %1458 = dma.vmem_to_hbm [thread:$0]  %s1454_s29, 32, %s1456_s20, [#allocation3]  }
 0x5df   :  { %1657 = dma.done.wait [#allocation3], 32  }
 0x5e0   :  { %1658 = vsyncadd [#allocation3], 4294967264 }
 0x5e1   :  { %1463 = vsyncpa [#allocation3], 1 }

</bundles_post_ra>
